<compile_context>
chip_gen: v6e
topology: v6e:2x2x1
jax: 0.10.0
libtpu: 0.0.40
codegen_flags: <defaults>
</compile_context>

<pallas_src>
import functools

import jax
import jax.numpy as jnp
from jax.experimental import pallas as pl
from jax.experimental.pallas import tpu as pltpu

_LANE = 128
_ROW_ALIGN = 32          # int8 label tile is (32, 128); keep blocks 32-row aligned
_BLOCK_ROWS_MIN = 512    # keeps the ~0.35 us/step grid overhead < ~10%
_BLOCK_ROWS_MAX = 8192   # ~9 MiB of inputs per step, ~18 MiB double-buffered
_TARGET_STEPS = 8        # >= 2 for v7x megacore + DMA/compute overlap


def _data_loss_kernel(n_valid_ref, dist_ref, label_ref, out_ref, *,
                      scale, margin, block_rows):
    pid = pl.program_id(0)
    n_valid = n_valid_ref[0]

    d0 = dist_ref[0]                          # (block_rows, 128) f32, class-0 row
    d1 = dist_ref[1]                          # (block_rows, 128) f32, class-1 row
    m = label_ref[...].astype(jnp.float32)    # {0., 1.} label as a multiplier

    # pos = dist[label], neg = dist[1 - label]  (labels assumed in {0, 1})
    md = m * (d1 - d0)
    pos = d0 + md
    neg = d1 - md

    # loss_i = -log(exp(a)/(exp(a)+exp(b))) = softplus(b - a),
    #   a = scale*cos(pos + margin), b = scale*cos(neg)
    x = scale * (jnp.cos(neg) - jnp.cos(pos + margin))
    loss = jnp.maximum(x, 0.0) + jnp.log1p(jnp.exp(-jnp.abs(x)))  # stable softplus

    def store(l):
        # Lane-dense (8, 128) partial sums into this block's own output slot:
        # no carried accumulator, so the grid axis stays "parallel".
        out_ref[0] = l.reshape(block_rows // 8, 8, _LANE).sum(axis=0)

    block_elems = block_rows * _LANE
    block_end = (pid + 1) * block_elems
    needs_mask = block_end > n_valid

    # Slow path: only the ragged last block pays for the iota/compare/select
    # (also neutralizes Pallas-padded garbage in the edge block via select,
    # which does not propagate NaN/Inf from the unselected branch).
    @pl.when(needs_mask)
    def _():
        base = pid * block_elems
        ridx = jax.lax.broadcasted_iota(jnp.int32, (block_rows, _LANE), 0)
        lidx = jax.lax.broadcasted_iota(jnp.int32, (block_rows, _LANE), 1)
        gidx = base + ridx * _LANE + lidx
        store(jnp.where(gidx < n_valid, loss, 0.0))

    # Fast path: fully-valid block, no mask arithmetic on the hot VALU slot.
    @pl.when(jnp.logical_not(needs_mask))
    def _():
        store(loss)


def data_loss(dist, label, scale, margin, *, min_pallas_n=1024):
    """dist: (2, N) float; label: (N,) int in {0, 1}. Returns scalar f32."""
    two, n = dist.shape
    assert two == 2, "DataLoss expects dist of shape (2, N)"

    dist = dist.astype(jnp.float32)
    label = label.astype(jnp.int8)   # labels in {0, 1}: 1 byte/elem on the HBM wire

    if n < min_pallas_n:
        # Tiny batch: a Pallas launch is pure overhead; let XLA fuse it.
        m = label.astype(jnp.float32)
        md = m * (dist[1] - dist[0])
        pos = dist[0] + md
        neg = dist[1] - md
        x = scale * (jnp.cos(neg) - jnp.cos(pos + margin))
        return jnp.sum(jnp.maximum(x, 0.0) + jnp.log1p(jnp.exp(-jnp.abs(x))))

    # Lane/sublane-dense slab: (2, rows, 128) with rows 32-aligned ONLY
    # (not rounded up to a whole block) — the edge block is handled in-kernel.
    rows = pl.cdiv(n, _LANE)
    rows = pl.cdiv(rows, _ROW_ALIGN) * _ROW_ALIGN

    # Adaptive block size: aim for >=2 grid steps (v7x dual-TC sharding + DMA
    # pipelining), up to ~_TARGET_STEPS for large N, block in [32, 8192] rows.
    steps = max(2, min(_TARGET_STEPS, pl.cdiv(rows, _BLOCK_ROWS_MIN)))
    block_rows = pl.cdiv(pl.cdiv(rows, steps), _ROW_ALIGN) * _ROW_ALIGN
    block_rows = max(_ROW_ALIGN, min(block_rows, _BLOCK_ROWS_MAX))
    grid = pl.cdiv(rows, block_rows)

    total = rows * _LANE
    if total == n:
        # Aligned case: reshape is a free bitcast — no extra HBM pass.
        dist_slab = dist.reshape(2, rows, _LANE)
        label_slab = label.reshape(rows, _LANE)
    else:
        dist_slab = jnp.pad(dist, ((0, 0), (0, total - n))).reshape(2, rows, _LANE)
        label_slab = jnp.pad(label, (0, total - n)).reshape(rows, _LANE)

    kernel = functools.partial(
        _data_loss_kernel, scale=float(scale), margin=float(margin),
        block_rows=block_rows)

    n_valid = jnp.array([n], dtype=jnp.int32)   # SMEM scalar: no recompile per N

    partials = pl.pallas_call(
        kernel,
        out_shape=jax.ShapeDtypeStruct((grid, 8, _LANE), jnp.float32),
        grid_spec=pltpu.PrefetchScalarGridSpec(
            num_scalar_prefetch=1,
            grid=(grid,),
            in_specs=[
                pl.BlockSpec((2, block_rows, _LANE), lambda i, n_ref: (0, i, 0)),
                pl.BlockSpec((block_rows, _LANE), lambda i, n_ref: (i, 0)),
            ],
            out_specs=pl.BlockSpec((1, 8, _LANE), lambda i, n_ref: (i, 0, 0)),
        ),
        compiler_params=pltpu.CompilerParams(
            dimension_semantics=("parallel",)),
    )(n_valid, dist_slab, label_slab)

    # Tiny (grid, 8, 128) partial-sum tensor -> scalar outside the kernel.
    return jnp.sum(partials)


def _data_loss_ref(dist, label, scale, margin):
    """Pure-JAX mirror of the PyTorch loop (same non-stable formulation)."""
    n = label.shape[0]
    idx = jnp.arange(n)
    pos = dist[label, idx]
    neg = dist[1 - label, idx]
    temp = jnp.exp(scale * jnp.cos(pos + margin))
    other = jnp.exp(scale * jnp.cos(neg))
    return jnp.sum(-jnp.log(temp / (temp + other)))


if __name__ == "__main__":
    key = jax.random.PRNGKey(0)
    k1, k2, k3, k4, k5, k6 = jax.random.split(key, 6)

    SCALE = 4.0    # module __init__ args, chosen deterministically
    MARGIN = 0.35

    # (1) Pallas path, single block, ragged tail (exercises the masked branch).
    N = 2000
    dist = jax.random.uniform(k1, (2, N), dtype=jnp.float32, minval=0.0, maxval=3.0)
    label = jax.random.bernoulli(k2, 0.5, (N,)).astype(jnp.int32)
    out = jax.block_until_ready(data_loss(dist, label, SCALE, MARGIN))
    ref = _data_loss_ref(dist, label, SCALE, MARGIN)
    assert jnp.allclose(out, ref, rtol=1e-4, atol=1e-3), (out, ref)

    # (2) Pallas path, multi-block grid with a partial edge block
    #     (exercises the unmasked fast path + Pallas-padded edge block).
    N_MID = 20000
    dist_m = jax.random.uniform(k3, (2, N_MID), dtype=jnp.float32, minval=0.0, maxval=3.0)
    label_m = jax.random.bernoulli(k4, 0.5, (N_MID,)).astype(jnp.int32)
    out_m = jax.block_until_ready(data_loss(dist_m, label_m, SCALE, MARGIN))
    ref_m = _data_loss_ref(dist_m, label_m, SCALE, MARGIN)
    assert jnp.allclose(out_m, ref_m, rtol=1e-4, atol=1e-2), (out_m, ref_m)

    # (3) Tiny batch takes the fused pure-JAX fast path.
    N_SMALL = 8
    dist_s = jax.random.uniform(k5, (2, N_SMALL), dtype=jnp.float32, minval=0.0, maxval=3.0)
    label_s = jax.random.bernoulli(k6, 0.5, (N_SMALL,)).astype(jnp.int32)
    out_s = jax.block_until_ready(data_loss(dist_s, label_s, SCALE, MARGIN))
    ref_s = _data_loss_ref(dist_s, label_s, SCALE, MARGIN)
    assert jnp.allclose(out_s, ref_s, rtol=1e-5, atol=1e-5), (out_s, ref_s)

    print("KERNEL_OK")
</pallas_src>

<mosaic_0001>
module attributes {stable_mosaic.version = 11 : i64} {
  func.func @_data_loss_kernel(%arg0: i32, %arg1: memref<1xi32, #tpu.memory_space<smem>>, %arg2: memref<2x32x128xf32, #tpu.memory_space<vmem>>, %arg3: memref<32x128xi8, #tpu.memory_space<vmem>>, %arg4: memref<1x8x128xf32, #tpu.memory_space<vmem>>) attributes {dimension_semantics = [#tpu.dimension_semantics<parallel>], iteration_bounds = array<i64: 1>, scalar_prefetch = 1 : i64, scratch_operands = 0 : i64, tpu.core_type = #tpu.core_type<tc>, window_params = [{transform_indices = @transform_0, window_bounds = array<i64: 2, 32, 128>}, {transform_indices = @transform_1, window_bounds = array<i64: 32, 128>}, {transform_indices = @transform_2, window_bounds = array<i64: 1, 8, 128>}]} {
    %c0 = arith.constant 0 : index
    %0 = memref.load %arg1[%c0] : memref<1xi32, #tpu.memory_space<smem>>
    %c0_0 = arith.constant 0 : index
    %c0_1 = arith.constant 0 : index
    %c0_2 = arith.constant 0 : index
    %1 = vector.load %arg2[%c0_0, %c0_1, %c0_2] : memref<2x32x128xf32, #tpu.memory_space<vmem>>, vector<1x32x128xf32>
    %2 = vector.shape_cast %1 : vector<1x32x128xf32> to vector<32x128xf32>
    %c1 = arith.constant 1 : index
    %c0_3 = arith.constant 0 : index
    %c0_4 = arith.constant 0 : index
    %3 = vector.load %arg2[%c1, %c0_3, %c0_4] : memref<2x32x128xf32, #tpu.memory_space<vmem>>, vector<1x32x128xf32>
    %4 = vector.shape_cast %3 : vector<1x32x128xf32> to vector<32x128xf32>
    %c0_5 = arith.constant 0 : index
    %c0_6 = arith.constant 0 : index
    %5 = vector.load %arg3[%c0_5, %c0_6] : memref<32x128xi8, #tpu.memory_space<vmem>>, vector<32x128xi8>
    %6 = arith.sitofp %5 : vector<32x128xi8> to vector<32x128xf32>
    %7 = arith.subf %4, %2 : vector<32x128xf32>
    %8 = arith.mulf %6, %7 : vector<32x128xf32>
    %9 = arith.addf %2, %8 : vector<32x128xf32>
    %10 = arith.subf %4, %8 : vector<32x128xf32>
    %11 = math.cos %10 : vector<32x128xf32>
    %cst = arith.constant 3.500000e-01 : f32
    %12 = vector.broadcast %cst : f32 to vector<32x128xf32>
    %13 = arith.addf %9, %12 : vector<32x128xf32>
    %14 = math.cos %13 : vector<32x128xf32>
    %15 = arith.subf %11, %14 : vector<32x128xf32>
    %cst_7 = arith.constant 4.000000e+00 : f32
    %16 = vector.broadcast %cst_7 : f32 to vector<32x128xf32>
    %17 = arith.mulf %16, %15 : vector<32x128xf32>
    %cst_8 = arith.constant 0.000000e+00 : f32
    %18 = vector.broadcast %cst_8 : f32 to vector<32x128xf32>
    %19 = arith.maximumf %17, %18 : vector<32x128xf32>
    %20 = math.absf %17 : vector<32x128xf32>
    %cst_9 = arith.constant 0.000000e+00 : f32
    %21 = vector.broadcast %cst_9 : f32 to vector<32x128xf32>
    %22 = arith.subf %21, %20 : vector<32x128xf32>
    %23 = math.exp %22 : vector<32x128xf32>
    %24 = math.log1p %23 : vector<32x128xf32>
    %25 = arith.addf %19, %24 : vector<32x128xf32>
    %c1_i32 = arith.constant 1 : i32
    %26 = arith.addi %arg0, %c1_i32 : i32
    %c4096_i32 = arith.constant 4096 : i32
    %27 = arith.muli %26, %c4096_i32 : i32
    %28 = arith.cmpi sgt, %27, %0 : i32
    %29 = arith.extui %28 : i1 to i32
    %c0_i32 = arith.constant 0 : i32
    %30 = arith.cmpi ne, %29, %c0_i32 : i32
    scf.if %30 {
      %c4096_i32_11 = arith.constant 4096 : i32
      %34 = arith.muli %arg0, %c4096_i32_11 : i32
      %35 = tpu.iota {dimensions = array<i32: 0>} : vector<32x128xi32>
      %36 = tpu.iota {dimensions = array<i32: 1>} : vector<32x128xi32>
      %c128_i32 = arith.constant 128 : i32
      %37 = vector.broadcast %c128_i32 : i32 to vector<32x128xi32>
      %38 = arith.muli %35, %37 : vector<32x128xi32>
      %39 = vector.broadcast %34 : i32 to vector<32x128xi32>
      %40 = arith.addi %39, %38 : vector<32x128xi32>
      %41 = arith.addi %40, %36 : vector<32x128xi32>
      %42 = vector.broadcast %0 : i32 to vector<32x128xi32>
      %43 = arith.cmpi slt, %41, %42 : vector<32x128xi32>
      %cst_12 = arith.constant 0.000000e+00 : f32
      %44 = vector.broadcast %cst_12 : f32 to vector<32x128xf32>
      %45 = arith.select %43, %25, %44 : vector<32x128xi1>, vector<32x128xf32>
      %46 = vector.shape_cast %45 : vector<32x128xf32> to vector<4x8x128xf32>
      %cst_13 = arith.constant dense<0.000000e+00> : vector<8x128xf32>
      %47 = vector.multi_reduction <add>, %46, %cst_13 [0] : vector<4x8x128xf32> to vector<8x128xf32>
      %c0_14 = arith.constant 0 : index
      %c0_15 = arith.constant 0 : index
      %c0_16 = arith.constant 0 : index
      %48 = vector.load %arg4[%c0_14, %c0_15, %c0_16] : memref<1x8x128xf32, #tpu.memory_space<vmem>>, vector<1x8x128xf32>
      %49 = vector.shape_cast %48 : vector<1x8x128xf32> to vector<8x128xf32>
      %50 = vector.shape_cast %47 : vector<8x128xf32> to vector<1x8x128xf32>
      tpu.vector_store %arg4[%c0_14, %c0_15, %c0_16], %50 {strides = array<i32>} : memref<1x8x128xf32, #tpu.memory_space<vmem>>, vector<1x8x128xf32>,
    } else {
    }
    %true = arith.constant true
    %31 = arith.xori %28, %true : i1
    %32 = arith.extui %31 : i1 to i32
    %c0_i32_10 = arith.constant 0 : i32
    %33 = arith.cmpi ne, %32, %c0_i32_10 : i32
    scf.if %33 {
      %34 = vector.shape_cast %25 : vector<32x128xf32> to vector<4x8x128xf32>
      %cst_11 = arith.constant dense<0.000000e+00> : vector<8x128xf32>
      %35 = vector.multi_reduction <add>, %34, %cst_11 [0] : vector<4x8x128xf32> to vector<8x128xf32>
      %c0_12 = arith.constant 0 : index
      %c0_13 = arith.constant 0 : index
      %c0_14 = arith.constant 0 : index
      %36 = vector.load %arg4[%c0_12, %c0_13, %c0_14] : memref<1x8x128xf32, #tpu.memory_space<vmem>>, vector<1x8x128xf32>
      %37 = vector.shape_cast %36 : vector<1x8x128xf32> to vector<8x128xf32>
      %38 = vector.shape_cast %35 : vector<8x128xf32> to vector<1x8x128xf32>
      tpu.vector_store %arg4[%c0_12, %c0_13, %c0_14], %38 {strides = array<i32>} : memref<1x8x128xf32, #tpu.memory_space<vmem>>, vector<1x8x128xf32>,
    } else {
    }
    return
  }
  func.func @transform_0(%arg0: i32, %arg1: memref<1xi32, #tpu.memory_space<smem>>) -> (i32, i32, i32) {
    %c0_i32 = arith.constant 0 : i32
    %c0_i32_0 = arith.constant 0 : i32
    %c0_i32_1 = arith.constant 0 : i32
    return %c0_i32, %arg0, %c0_i32_0 : i32, i32, i32
  }
  func.func @transform_1(%arg0: i32, %arg1: memref<1xi32, #tpu.memory_space<smem>>) -> (i32, i32) {
    %c0_i32 = arith.constant 0 : i32
    %c0_i32_0 = arith.constant 0 : i32
    return %arg0, %c0_i32 : i32, i32
  }
  func.func @transform_2(%arg0: i32, %arg1: memref<1xi32, #tpu.memory_space<smem>>) -> (i32, i32, i32) {
    %c0_i32 = arith.constant 0 : i32
    %c0_i32_0 = arith.constant 0 : i32
    %c0_i32_1 = arith.constant 0 : i32
    return %arg0, %c0_i32, %c0_i32_0 : i32, i32, i32
  }
}

</mosaic_0001>

<bundles_post_ra>
// kernel: tpu_custom_call.1
= control target key start
LH: loop header
LB: loop body
LE: loop exit
PB: predicated region body
PF: predicated region fallthrough
CT: control target
= control target key end

     0   :  { %9 = vsyncpa [#allocation5], 0  ;;  %s2014_s0 = inlined_call_operand.<no memory space> [shape: s32[1], index: 0, kind: input, shape index: {}]   ;;  %s2015_s1 = inlined_call_operand.hbm [shape: f32[2,32,128], index: 1, kind: input, shape index: {}]   ;;  %s2016_s2 = inlined_call_operand.hbm [shape: s8[32,128], index: 2, kind: input, shape index: {}]   ;;  %s2017_s3 = inlined_call_operand.hbm [shape: f32[1,8,128], index: 3, kind: output, shape index: {}]  }
   0x1   :  { %10 = vsyncpa [#allocation8], 0 }
   0x2   :  { %11 = vsyncpa [#allocation6], 0  ;;  %s1228_s12 = smov [#allocation4]  }
   0x3   :  { %s17_s13 = sshll.u32 %s1228_s12, 4  ;;  %s18_s13 = int_to_ptr.vmem [resolvable:$true] %s17_s13 }
   0x4   :  { %s1170_s14 = scalar_lea.vmem %s18_s13, 1024  ;;  %p1175_p1 = scmp.lt.s32.totalorder %s18_s13, %s18_s13 }
   0x5   :  { %p1171_p0 = scmp.ne.s32.totalorder %s18_s13, %s1170_s14  ;;  %p1176_p2 = scmp.lt.s32.totalorder %s1170_s14, %s1170_s14 }
   0x7   :  { %p1177_p3 = por %p1176_p2, %p1175_p1 }
   0x9   :  { %p1178_p4 = pnand %p1177_p3, %p1171_p0 }
   0xb   :  { %1181 = shalt.err (!%p1178_p4)
}
   0xc   :  { %s1229_s15 = smov 128   ;;  %s1230_s16 = smov 8  }
   0xd   :  { %23 = dma.hbm_to_vmem [thread:$0]  %s2015_s1, 1024, %s18_s13, [#allocation5], %s1229_s15, %s1229_s15, %s1230_s16  }
   0xe   :  { %s1231_s19 = smov [#allocation7]  }
   0xf   :  { %s30_s20 = sshll.u32 %s1231_s19, 4  ;;  %s31_s20 = int_to_ptr.vmem [resolvable:$true] %s30_s20 }
  0x10   :  { %s1190_s21 = scalar_lea.vmem %s31_s20, 128  ;;  %p1195_p6 = scmp.lt.s32.totalorder %s31_s20, %s31_s20 }
  0x11   :  { %p1191_p5 = scmp.ne.s32.totalorder %s31_s20, %s1190_s21  ;;  %p1196_p7 = scmp.lt.s32.totalorder %s1190_s21, %s1190_s21 }
  0x13   :  { %p1197_p8 = por %p1196_p7, %p1195_p6 }
  0x15   :  { %p1198_p9 = pnand %p1197_p8, %p1191_p5 }
  0x17   :  { %1201 = shalt.err (!%p1198_p9)
}
  0x18   :  { %33 = dma.hbm_to_vmem [thread:$0]  %s2016_s2, 128, %s31_s20, [#allocation8]  }
  0x19   :  { %1222 = dma.done.wait [#allocation5], 1024  }
  0x1a   :  { %1223 = vsyncadd [#allocation5], 4294966272 }
  0x1b   :  { %1224 = dma.done.wait [#allocation8], 128  }
  0x1c   :  { %1225 = vsyncadd [#allocation8], 4294967168  ;;  %v1265_v0 = vld [vmem:[#allocation4] sm:$0xff]  ;;  %v1267_v1 = vld [vmem:[#allocation4 + $0x8] sm:$0xff]  ;;  %v1232_v53 = vmov 683565275  }
  0x1d   :  { %v46_v2 = vld [vmem:[#allocation4 + $0x20] sm:$0xff]  ;;  %v47_v3 = vld [vmem:[#allocation4 + $0x28] sm:$0xff]  ;;  %v1269_v4 = vld [vmem:[#allocation4 + $0x10] sm:$0xff]  ;;  %v1233_v55 = vmov 2475754826   ;;  %p1068_p10 = scmp.ge.s32.totalorder %s2014_s0, 4096 }
  0x1e   :  { %v48_v5 = vld [vmem:[#allocation4 + $0x30] sm:$0xff]  ;;  %v50_v6 = vld [vmem:[#allocation7] sm:$0xff]  ;;  %v59_v10 = vsub.f32 %v46_v2, %v1265_v0  ;;  %v60_v11 = vsub.f32 %v47_v3, %v1267_v1  ;;  %v1298_v34 = vld [vmem:[#allocation4 + $0x18] sm:$0xff]  ;;  %v1234_v57 = vmov 2131351028  }
  0x1f   :  { %v51_v7 = vunpack.c.0.s8 %v50_v6  ;;  %v52_v8 = vunpack.c.1.s8 %v50_v6  ;;  %v53_v9 = vunpack.c.2.s8 %v50_v6  ;;  %v61_v15 = vsub.f32 %v48_v5, %v1269_v4  ;;  %v1300_v35 = vld [vmem:[#allocation4 + $0x38] sm:$0xff] }
  0x20   :  { %v54_v36 = vunpack.c.3.s8 %v50_v6  ;;  %v62_v42 = vsub.f32 %v1300_v35, %v1298_v34  ;;  %v1235_v59 = vmov 2102212464   ;;  %v1236_v61 = vmov 920167782  }
  0x21   :  { %v55_v12 = vcvt.s32.f32 %v51_v7  ;;  %v56_v13 = vcvt.s32.f32 %v52_v8  ;;  %v57_v14 = vcvt.s32.f32 %v53_v9  ;;  %v1237_v8 = vmov 1326507024  }
  0x22   :  { %v1304_v44 = vcvt.s32.f32 %v54_v36 }
  0x23   :  { %v1274_v16 = vmul.f32 %v59_v10, %v55_v12  ;;  %v1276_v17 = vmul.f32 %v60_v11, %v56_v13  ;;  %v1278_v18 = vmul.f32 %v61_v15, %v57_v14 }
  0x25   :  { %v1281_v19 = vsub.f32 %v46_v2, %v1274_v16  ;;  %v1284_v20 = vsub.f32 %v47_v3, %v1276_v17  ;;  %v1287_v21 = vsub.f32 %v48_v5, %v1278_v18 }
  0x27   :  { %v75_v22 = vand.u32 2147483647, %v1281_v19  ;;  %v78_v23 = vand.u32 2139095040, %v1281_v19  ;;  %v178_v24 = vand.u32 2147483647, %v1284_v20  ;;  %v181_v25 = vand.u32 2139095040, %v1284_v20 }
  0x28   :  { %v284_v30 = vand.u32 2139095040, %v1287_v21 }
  0x29   :  { %v79_v26 = vshrl.u32 %v78_v23, 23  ;;  %v82_v27 = vand.u32 8388607, %v75_v22  ;;  %v182_v28 = vshrl.u32 %v181_v25, 23  ;;  %v185_v29 = vand.u32 8388607, %v178_v24 }
  0x2a   :  { %v285_v33 = vshrl.u32 %v284_v30, 23 }
  0x2b   :  { %v1035_v31 = vadd.s32 4294967169, %v79_v26  ;;  %v1039_v32 = vadd.s32 4294967169, %v182_v28  ;;  %v83_v38 = vor.u32 8388608, %v82_v27  ;;  %v186_v39 = vor.u32 8388608, %v185_v29 }
  0x2c   :  { %v1043_v41 = vadd.s32 4294967169, %v285_v33 }
  0x2d   :  { %v85_v37 = vadd.s32 1, %v1035_v31  ;;  %v188_v40 = vadd.s32 1, %v1039_v32  ;;  %v1306_v48 = vshll.u32 %v83_v38, 8  ;;  %v1308_v50 = vshll.u32 %v186_v39, 8 }
  0x2e   :  { %v1310_v51 = vadd.s32 1, %v1043_v41 }
  0x2f   :  { %vm86_vm0 = vcmp.gt.s32.totalorder %v85_v37, 0  ;;  %vm189_vm1 = vcmp.gt.s32.totalorder %v188_v40, 0 }
  0x30   :  { %v87_v43 = vsel %vm86_vm0, %v85_v37, 0  ;;  %v190_v47 = vsel %vm189_vm1, %v188_v40, 0  ;;  %vm292_vm6 = vcmp.gt.s32.totalorder %v1310_v51, 0 }
  0x31   :  { %v88_v45 = vshrl.u32 %v87_v43, 5  ;;  %v89_v46 = vand.u32 31, %v87_v43  ;;  %v192_v49 = vand.u32 31, %v190_v47  ;;  %v1317_v63 = vshrl.u32 %v190_v47, 5 }
  0x33   :  { %v90_v52 = vsub.s32 32, %v89_v46  ;;  %v92_v54 = vshll.u32 %v1232_v53, %v89_v46  ;;  %v95_v56 = vshll.u32 %v1233_v55, %v89_v46  ;;  %v98_v58 = vshll.u32 %v1234_v57, %v89_v46 }
  0x34   :  { %v101_v60 = vshll.u32 %v1235_v59, %v89_v46  ;;  %v104_v62 = vshll.u32 %v1236_v61, %v89_v46  ;;  %vm107_vm2 = vcmp.lt.s32.totalorder %v88_v45, 1  ;;  %vm108_vm3 = vcmp.lt.s32.totalorder %v88_v45, 2 }
  0x35   :  { %v91_v2 = vshrl.u32 %v1232_v53, %v90_v52  ;;  %v93_v3 = vshrl.u32 %v1233_v55, %v90_v52  ;;  %v96_v5 = vshrl.u32 %v1234_v57, %v90_v52  ;;  %v99_v6 = vshrl.u32 %v1235_v59, %v90_v52 }
  0x36   :  { %v102_v7 = vshrl.u32 %v1236_v61, %v90_v52  ;;  %v105_v9 = vshrl.u32 %v1237_v8, %v90_v52  ;;  %vm110_vm4 = vcmp.lt.s32.totalorder %v88_v45, 4  ;;  %v193_v13 = vsub.s32 32, %v192_v49 }
  0x37   :  { %v94_v10 = vor.u32 %v93_v3, %v92_v54  ;;  %v97_v11 = vor.u32 %v96_v5, %v95_v56  ;;  %v100_v12 = vor.u32 %v99_v6, %v98_v58  ;;  %vm109_vm5 = vcmp.lt.s32.totalorder %v88_v45, 3 }
  0x38   :  { %v103_v14 = vor.u32 %v102_v7, %v101_v60  ;;  %v106_v15 = vor.u32 %v105_v9, %v104_v62  ;;  %v195_v23 = vshll.u32 %v1232_v53, %v192_v49  ;;  %v198_v32 = vshll.u32 %v1233_v55, %v192_v49 }
  0x39   :  { %v111_v25 = vsel %vm107_vm2, %v91_v2, %v94_v10  ;;  %v112_v26 = vsel %vm110_vm4, %v100_v12, 2102212464  ;;  %v115_v27 = vsel %vm107_vm2, %v94_v10, %v97_v11  ;;  %v119_v28 = vsel %vm107_vm2, %v97_v11, %v100_v12 }
  0x3a   :  { %v113_v29 = vsel %vm109_vm5, %v97_v11, %v112_v26  ;;  %v116_v30 = vsel %vm110_vm4, %v103_v14, 920167782  ;;  %v120_v31 = vsel %vm110_vm4, %v106_v15, 1326507024  ;;  %v194_v37 = vshrl.u32 %v1232_v53, %v193_v13 }
  0x3b   :  { %v117_v33 = vsel %vm109_vm5, %v100_v12, %v116_v30  ;;  %v121_v36 = vsel %vm109_vm5, %v103_v14, %v120_v31  ;;  %v196_v38 = vshrl.u32 %v1233_v55, %v193_v13  ;;  %v114_v39 = vsel %vm108_vm3, %v111_v25, %v113_v29 }
  0x3c   :  { %v118_v40 = vsel %vm108_vm3, %v115_v27, %v117_v33  ;;  %v122_v41 = vsel %vm108_vm3, %v119_v28, %v121_v36  ;;  %v199_v43 = vshrl.u32 %v1234_v57, %v193_v13  ;;  %v201_v60 = vshll.u32 %v1234_v57, %v192_v49 }
  0x3d   :  { %v1338_v46 = vmul.u32.u64.low %v1306_v48, %v122_v41  ;;  %v1339_v47 = vmul.u32.u64.high %v1306_v48, %v122_v41, %v1338_v46  ;;  %v1342_v52 = vmul.u32.u64.low %v1306_v48, %v118_v40  ;;  %v1343_v54 = vmul.u32.u64.high %v1306_v48, %v118_v40, %v1342_v52 }
  0x3e   :  { %v197_v56 = vor.u32 %v196_v38, %v195_v23  ;;  %v200_v58 = vor.u32 %v199_v43, %v198_v32  ;;  %v202_v62 = vshrl.u32 %v1235_v59, %v193_v13  ;;  %v204_v45 = vshll.u32 %v1235_v59, %v192_v49 }
  0x3f   :  { %v205_v2 = vshrl.u32 %v1236_v61, %v193_v13  ;;  %v207_v3 = vshll.u32 %v1236_v61, %v192_v49  ;;  %v208_v5 = vshrl.u32 %v1237_v8, %v193_v13  ;;  %v130_v6 = vmul.u32 %v1306_v48, %v114_v39 }
  0x40   :  { %v203_v7 = vor.u32 %v202_v62, %v201_v60  ;;  %vm210_vm7 = vcmp.lt.s32.totalorder %v1317_v63, 1  ;;  %vm211_vm8 = vcmp.lt.s32.totalorder %v1317_v63, 2  ;;  %vm132_vm9 = vc.u32 %v1339_v47, %v1342_v52 }
  0x41   :  { %v133_v9 = vadd.s32 1, %v1343_v54  ;;  %v206_v10 = vor.u32 %v205_v2, %v204_v45  ;;  %vm212_vm10 = vcmp.lt.s32.totalorder %v1317_v63, 3  ;;  %v209_v11 = vor.u32 %v208_v5, %v207_v3 }
  0x42   :  { %vm213_vm11 = vcmp.lt.s32.totalorder %v1317_v63, 4  ;;  %v214_v49 = vsel %vm210_vm7, %v194_v37, %v197_v56  ;;  %v218_v12 = vsel %vm210_vm7, %v197_v56, %v200_v58  ;;  %v222_v15 = vsel %vm210_vm7, %v200_v58, %v203_v7 }
  0x43   :  { %v134_v48 = vsel %vm132_vm9, %v133_v9, %v1343_v54  ;;  %v215_v13 = vsel %vm213_vm11, %v203_v7, 2102212464  ;;  %v219_v14 = vsel %vm213_vm11, %v206_v10, 920167782  ;;  %v223_v27 = vsel %vm213_vm11, %v209_v11, 1326507024 }
  0x44   :  { %v135_v23 = vadd.s32 %v134_v48, %v130_v6  ;;  %v216_v25 = vsel %vm212_vm10, %v200_v58, %v215_v13  ;;  %v220_v26 = vsel %vm212_vm10, %v203_v7, %v219_v14  ;;  %v224_v30 = vsel %vm212_vm10, %v206_v10, %v223_v27 }
  0x45   :  { %v217_v28 = vsel %vm211_vm8, %v214_v49, %v216_v25  ;;  %v221_v29 = vsel %vm211_vm8, %v218_v12, %v220_v26  ;;  %v293_v31 = vsel %vm292_vm6, %v1310_v51, 0  ;;  %v225_v33 = vsel %vm211_vm8, %v222_v15, %v224_v30 }
  0x46   :  { %v136_v32 = vadd.s32 536870912, %v135_v23  ;;  %v1371_v36 = vmul.u32.u64.low %v1308_v50, %v221_v29  ;;  %v1372_v37 = vmul.u32.u64.high %v1308_v50, %v221_v29, %v1371_v36  ;;  %v281_v41 = vand.u32 2147483647, %v1287_v21 }
  0x47   :  { %v1376_v38 = vmul.u32.u64.low %v1308_v50, %v225_v33  ;;  %v1377_v39 = vmul.u32.u64.high %v1308_v50, %v225_v33, %v1376_v38  ;;  %v295_v43 = vand.u32 31, %v293_v31  ;;  %v1386_v51 = vmul.f32 %v62_v42, %v1304_v44 }
  0x48   :  { %v1379_v40 = vshrl.u32 %v136_v32, 30  ;;  %v233_v63 = vmul.u32 %v1308_v50, %v217_v28  ;;  %v236_v54 = vadd.s32 1, %v1372_v37  ;;  %v288_v42 = vand.u32 8388607, %v281_v41 }
  0x49   :  { %v296_v56 = vsub.s32 32, %v295_v43  ;;  %v1393_v58 = vsub.f32 %v1300_v35, %v1386_v51  ;;  %vm235_vm12 = vc.u32 %v1377_v39, %v1371_v36  ;;  %v1402_v44 = vshrl.u32 %v293_v31, 5 }
  0x4a   :  { %v138_v46 = vshll.u32 %v1379_v40, 30  ;;  %v237_v62 = vsel %vm235_vm12, %v236_v54, %v1372_v37  ;;  %v298_v45 = vshll.u32 %v1232_v53, %v295_v43  ;;  %v301_v35 = vshll.u32 %v1233_v55, %v295_v43 }
  0x4b   :  { %v238_v50 = vadd.s32 %v237_v62, %v233_v63  ;;  %v299_v2 = vshrl.u32 %v1233_v55, %v296_v56  ;;  %v302_v5 = vshrl.u32 %v1234_v57, %v296_v56  ;;  %v304_v6 = vshll.u32 %v1234_v57, %v295_v43 }
  0x4c   :  { %v1397_v60 = vsub.s32 %v135_v23, %v138_v46  ;;  %v305_v7 = vshrl.u32 %v1235_v59, %v296_v56  ;;  %v307_v10 = vshll.u32 %v1235_v59, %v295_v43  ;;  %v289_v49 = vor.u32 8388608, %v288_v42 }
  0x4d   :  { %v239_v9 = vadd.s32 536870912, %v238_v50  ;;  %vm316_vm13 = vcmp.lt.s32.totalorder %v1402_v44, 4  ;;  %v387_v12 = vand.u32 2139095040, %v1393_v58  ;;  %v300_v13 = vor.u32 %v299_v2, %v298_v45 }
  0x4e   :  { %v141_v3 = vsub.s32 0, %v1397_v60  ;;  %v308_v14 = vshrl.u32 %v1236_v61, %v296_v56  ;;  %v310_v15 = vshll.u32 %v1236_v61, %v295_v43  ;;  %v303_v25 = vor.u32 %v302_v5, %v301_v35 }
  0x4f   :  { %v1415_v48 = vshrl.u32 %v239_v9, 30  ;;  %v306_v26 = vor.u32 %v305_v7, %v304_v6  ;;  %v311_v27 = vshrl.u32 %v1237_v8, %v296_v56  ;;  %vm313_vm14 = vcmp.lt.s32.totalorder %v1402_v44, 1 }
  0x50   :  { %v1036_v11 = vmin.u32 %v141_v3, %v1397_v60  ;;  %v309_v29 = vor.u32 %v308_v14, %v307_v10  ;;  %vm315_vm15 = vcmp.lt.s32.totalorder %v1402_v44, 3  ;;  %v388_v32 = vshrl.u32 %v387_v12, 23 }
  0x51   :  { %v241_v28 = vshll.u32 %v1415_v48, 30  ;;  %v312_v31 = vor.u32 %v311_v27, %v310_v15  ;;  %v297_v37 = vshrl.u32 %v1232_v53, %v296_v56  ;;  %vm314_vm0 = vcmp.lt.s32.totalorder %v1402_v44, 2 }
  0x52   :  { %v143_v23 = vclz %v1036_v11  ;;  %v322_v38 = vsel %vm316_vm13, %v309_v29, 920167782  ;;  %v321_v43 = vsel %vm313_vm14, %v300_v13, %v303_v25  ;;  %v325_v56 = vsel %vm313_vm14, %v303_v25, %v306_v26 }
  0x53   :  { %v1423_v33 = vsub.s32 %v238_v50, %v241_v28  ;;  %v323_v63 = vsel %vm315_vm15, %v306_v26, %v322_v38  ;;  %v326_v46 = vsel %vm316_vm13, %v312_v31, 1326507024  ;;  %v329_v62 = vshll.u32 %v289_v49, 8 }
  0x54   :  { %v1037_v30 = vadd.s32 4294967294, %v143_v23  ;;  %v327_v50 = vsel %vm315_vm15, %v309_v29, %v326_v46  ;;  %v1047_v45 = vadd.s32 4294967169, %v388_v32  ;;  %v318_v35 = vsel %vm316_vm13, %v306_v26, 2102212464 }
  0x55   :  { %v244_v54 = vsub.s32 0, %v1423_v33  ;;  %v324_v3 = vsel %vm314_vm0, %v321_v43, %v323_v63  ;;  %v317_v5 = vsel %vm313_vm14, %v297_v37, %v300_v13  ;;  %v328_v6 = vsel %vm314_vm0, %v325_v56, %v327_v50 }
  0x56   :  { %vm1038_vm1 = vcmp.lt.s32.totalorder %v1037_v30, 0  ;;  %v1449_v10 = vmul.u32.u64.low %v329_v62, %v328_v6  ;;  %v1450_v11 = vmul.u32.u64.high %v329_v62, %v328_v6, %v1449_v10  ;;  %v319_v49 = vsel %vm315_vm15, %v303_v25, %v318_v35 }
  0x57   :  { %v146_v42 = vsel %vm1038_vm1, 0, %v1037_v30  ;;  %v1040_v2 = vmin.u32 %v244_v54, %v1423_v33  ;;  %v1454_v12 = vmul.u32.u64.low %v329_v62, %v324_v3  ;;  %v1455_v14 = vmul.u32.u64.high %v329_v62, %v324_v3, %v1454_v12 }
  0x58   :  { %v151_v7 = vsub.s32 4294967266, %v146_v42  ;;  %v394_v15 = vadd.s32 1, %v1047_v45  ;;  %v131_v23 = vadd.s32 %v1342_v52, %v1339_v47  ;;  %v147_v13 = vsub.s32 32, %v146_v42 }
  0x59   :  { %v246_v9 = vclz %v1040_v2  ;;  %v320_v28 = vsel %vm314_vm0, %v317_v5, %v319_v49  ;;  %vm338_vm2 = vc.u32 %v1450_v11, %v1454_v12  ;;  %v339_v29 = vadd.s32 1, %v1455_v14 }
  0x5a   :  { %v152_v26 = vadd.s32 127, %v151_v7  ;;  %vm395_vm3 = vcmp.gt.s32.totalorder %v394_v15, 0  ;;  %v148_v25 = vshll.u32 %v1397_v60, %v146_v42  ;;  %v149_v30 = vshrl.u32 %v131_v23, %v147_v13 }
  0x5b   :  { %v1041_v27 = vadd.s32 4294967294, %v246_v9  ;;  %v336_v31 = vmul.u32 %v329_v62, %v320_v28  ;;  %v340_v47 = vsel %vm338_vm2, %v339_v29, %v1455_v14  ;;  %v396_v52 = vsel %vm395_vm3, %v394_v15, 0 }
  0x5c   :  { %v153_v32 = vshll.u32 %v152_v26, 23  ;;  %v398_v43 = vand.u32 31, %v396_v52  ;;  %v150_v44 = vor.u32 %v149_v30, %v148_v25  ;;  %v67_v46 = vadd.f32 %v1274_v16, %v1265_v0 }
  0x5d   :  { %vm1042_vm4 = vcmp.lt.s32.totalorder %v1041_v27, 0  ;;  %v341_v38 = vadd.s32 %v340_v47, %v336_v31  ;;  %v234_v62 = vadd.s32 %v1371_v36, %v1377_v39  ;;  %v384_v35 = vand.u32 2147483647, %v1393_v58 }
  0x5e   :  { %v249_v37 = vsel %vm1042_vm4, 0, %v1041_v27  ;;  %v154_v63 = vor.u32 4788187, %v153_v32  ;;  %v399_v50 = vsub.s32 32, %v398_v43  ;;  %v157_v60 = vcvt.s32.f32 %v150_v44 }
  0x5f   :  { %v254_v54 = vsub.s32 4294967266, %v249_v37  ;;  %v342_v56 = vadd.s32 536870912, %v341_v38  ;;  %v250_v42 = vsub.s32 32, %v249_v37  ;;  %v1472_v3 = vadd.f32 0.35, %v67_v46 }
  0x60   :  { %v155_v45 = vand.u32 2147483647, %v154_v63  ;;  %v1476_v6 = vshrl.u32 %v396_v52, 5  ;;  %v410_v0 = vshll.u32 %v1235_v59, %v398_v43  ;;  %v411_v16 = vshrl.u32 %v1236_v61, %v399_v50 }
  0x61   :  { %v255_v2 = vadd.s32 127, %v254_v54  ;;  %v1474_v5 = vshrl.u32 %v342_v56, 30  ;;  %v251_v9 = vshll.u32 %v1423_v33, %v249_v37  ;;  %v413_v10 = vshll.u32 %v1236_v61, %v398_v43 }
  0x62   :  { %v158_v7 = vmul.f32 %v157_v60, %v155_v45  ;;  %v414_v36 = vshrl.u32 %v1237_v8, %v399_v50  ;;  %v252_v39 = vshrl.u32 %v234_v62, %v250_v42  ;;  %v401_v49 = vshll.u32 %v1232_v53, %v398_v43 }
  0x63   :  { %v402_v14 = vshrl.u32 %v1233_v55, %v399_v50  ;;  %v404_v15 = vshll.u32 %v1233_v55, %v398_v43  ;;  %v256_v23 = vshll.u32 %v255_v2, 23  ;;  %v405_v13 = vshrl.u32 %v1234_v57, %v399_v50 }
  0x64   :  { %v407_v26 = vshll.u32 %v1234_v57, %v398_v43  ;;  %v408_v27 = vshrl.u32 %v1235_v59, %v399_v50  ;;  %v344_v33 = vshll.u32 %v1474_v5, 30  ;;  %v412_v28 = vor.u32 %v411_v16, %v410_v0 }
  0x65   :  { %vm77_vm5 = vcmp.lt.s32.totalorder %v1281_v19, 0  ;;  %v391_v29 = vand.u32 8388607, %v384_v35  ;;  %v415_v25 = vor.u32 %v414_v36, %v413_v10  ;;  %vm419_vm6 = vcmp.lt.s32.totalorder %v1476_v6, 4 }
  0x66   :  { %v159_v30 = vxor.u32 2147483648, %v158_v7  ;;  %v253_v31 = vor.u32 %v252_v39, %v251_v9  ;;  %vm416_vm7 = vcmp.lt.s32.totalorder %v1476_v6, 1  ;;  %v494_v32 = vand.u32 2139095040, %v1472_v3 }
  0x67   :  { %v257_v47 = vor.u32 4788187, %v256_v23  ;;  %v403_v52 = vor.u32 %v402_v14, %v401_v49  ;;  %v406_v37 = vor.u32 %v405_v13, %v404_v15  ;;  %v409_v43 = vor.u32 %v408_v27, %v407_v26 }
  0x68   :  { %v1496_v44 = vsub.s32 %v341_v38, %v344_v33  ;;  %vm418_vm8 = vcmp.lt.s32.totalorder %v1476_v6, 3  ;;  %v425_v63 = vsel %vm419_vm6, %v412_v28, 920167782  ;;  %v495_v46 = vshrl.u32 %v494_v32, 23 }
  0x69   :  { %v392_v54 = vor.u32 8388608, %v391_v29  ;;  %v429_v56 = vsel %vm419_vm6, %v415_v25, 1326507024  ;;  %vm1505_vm9 = vcmp.le.f32.partialorder %v75_v22, 0.7853982  ;;  %v160_v38 = vsel %vm77_vm5, %v159_v30, %v158_v7 }
  0x6a   :  { %v260_v60 = vcvt.s32.f32 %v253_v31  ;;  %v1051_v62 = vadd.s32 4294967169, %v495_v46  ;;  %v258_v42 = vand.u32 2147483647, %v257_v47  ;;  %vm417_vm10 = vcmp.lt.s32.totalorder %v1476_v6, 2 }
  0x6b   :  { %v424_v2 = vsel %vm416_vm7, %v403_v52, %v406_v37  ;;  %v426_v0 = vsel %vm418_vm8, %v409_v43, %v425_v63  ;;  %v347_v16 = vsub.s32 0, %v1496_v44  ;;  %v428_v22 = vsel %vm416_vm7, %v406_v37, %v409_v43 }
  0x6c   :  { %v430_v9 = vsel %vm418_vm8, %v412_v28, %v429_v56  ;;  %v501_v7 = vadd.s32 1, %v1051_v62  ;;  %v68_v10 = vadd.f32 %v1276_v17, %v1267_v1  ;;  %v1523_v36 = vshll.u32 %v392_v54, 8 }
  0x6d   :  { %v161_v39 = vsub.s32 4, %v1379_v40  ;;  %v400_v49 = vshrl.u32 %v1232_v53, %v399_v50  ;;  %v427_v14 = vsel %vm417_vm10, %v424_v2, %v426_v0  ;;  %v163_v15 = vsel %vm1505_vm9, %v1281_v19, %v160_v38 }
  0x6e   :  { %vm502_vm11 = vcmp.gt.s32.totalorder %v501_v7, 0  ;;  %v261_v23 = vmul.f32 %v260_v60, %v258_v42  ;;  %v431_v13 = vsel %vm417_vm10, %v428_v22, %v430_v9  ;;  %v1044_v1 = vmin.u32 %v347_v16, %v1496_v44 }
  0x6f   :  { %v503_v26 = vsel %vm502_vm11, %v501_v7, 0  ;;  %v421_v17 = vsel %vm419_vm6, %v409_v43, 2102212464  ;;  %v491_v50 = vand.u32 2147483647, %v1472_v3  ;;  %v69_v33 = vadd.f32 %v1278_v18, %v1269_v4 }
  0x70   :  { %v505_v27 = vand.u32 31, %v503_v26  ;;  %v1542_v28 = vadd.f32 %v1386_v51, %v1298_v34  ;;  %v1545_v29 = vmul.u32.u64.low %v1523_v36, %v427_v14  ;;  %v1546_v25 = vmul.u32.u64.high %v1523_v36, %v427_v14, %v1545_v29 }
  0x71   :  { %v1550_v30 = vmul.u32.u64.low %v1523_v36, %v431_v13  ;;  %v1551_v31 = vmul.u32.u64.high %v1523_v36, %v431_v13, %v1550_v30  ;;  %v1553_v32 = vadd.f32 0.35, %v68_v10  ;;  %1114 = vcosq.f32 %v163_v15 }
  0x72   :  { %v506_v47 = vsub.s32 32, %v505_v27  ;;  %vm180_vm12 = vcmp.lt.s32.totalorder %v1284_v20, 0  ;;  %v420_v4 = vsel %vm416_vm7, %v400_v49, %v403_v52  ;;  %v422_v18 = vsel %vm418_vm8, %v406_v37, %v421_v17 }
  0x73   :  { %v162_v34 = vsel %vm77_vm5, %v161_v39, %v1379_v40  ;;  %v262_v51 = vxor.u32 2147483648, %v261_v23  ;;  %v349_v43 = vclz %v1044_v1  ;;  %v498_v63 = vand.u32 8388607, %v491_v50 }
  0x74   :  { %1116 = vsinq.f32 %v163_v15  ;;  %v508_v46 = vshll.u32 %v1232_v53, %v505_v27  ;;  %v509_v54 = vshrl.u32 %v1233_v55, %v506_v47  ;;  %v511_v56 = vshll.u32 %v1233_v55, %v505_v27 }
  0x75   :  { %vm1570_vm13 = vcmp.le.f32.partialorder %v178_v24, 0.7853982  ;;  %v423_v40 = vsel %vm417_vm10, %v420_v4, %v422_v18  ;;  %v1576_v37 = vadd.f32 0.35, %v69_v33  ;;  %v512_v38 = vshrl.u32 %v1234_v57, %v506_v47 }
  0x76   :  { %v164_v60 = vsel %vm1505_vm9, 0, %v162_v34  ;;  %v504_v62 = vshrl.u32 %v503_v26, 5  ;;  %v514_v42 = vshll.u32 %v1234_v57, %v505_v27  ;;  %v515_v2 = vshrl.u32 %v1235_v59, %v506_v47 }
  0x77   :  { %v263_v24 = vsel %vm180_vm12, %v262_v51, %v261_v23  ;;  %v264_v0 = vsub.s32 4, %v1415_v48  ;;  %v1045_v16 = vadd.s32 4294967294, %v349_v43  ;;  %v499_v6 = vor.u32 8388608, %v498_v63 }
  0x78   :  { %v439_v22 = vmul.u32 %v1523_v36, %v423_v40  ;;  %v442_v9 = vadd.s32 1, %v1546_v25  ;;  %v510_v7 = vor.u32 %v509_v54, %v508_v46  ;;  %v513_v10 = vor.u32 %v512_v38, %v511_v56 }
  0x79   :  { %vm441_vm14 = vc.u32 %v1551_v31, %v1545_v29  ;;  %v507_v45 = vshrl.u32 %v1232_v53, %v506_v47  ;;  %v517_v39 = vshll.u32 %v1235_v59, %v505_v27  ;;  %v518_v49 = vshrl.u32 %v1236_v61, %v506_v47 }
  0x7a   :  { %v516_v14 = vor.u32 %v515_v2, %v514_v42  ;;  %v520_v15 = vshll.u32 %v1236_v61, %v505_v27  ;;  %v521_v23 = vshrl.u32 %v1237_v8, %v506_v47  ;;  %vm523_vm15 = vcmp.lt.s32.totalorder %v504_v62, 1 }
  0x7b   :  { %v519_v36 = vor.u32 %v518_v49, %v517_v39  ;;  %vm525_vm0 = vcmp.lt.s32.totalorder %v504_v62, 3  ;;  %vm526_vm1 = vcmp.lt.s32.totalorder %v504_v62, 4  ;;  %v539_v13 = vshll.u32 %v499_v6, 8 }
  0x7c   :  { %v522_v26 = vor.u32 %v521_v23, %v520_v15  ;;  %vm524_vm2 = vcmp.lt.s32.totalorder %v504_v62, 2  ;;  %v528_v1 = vsel %vm526_vm1, %v516_v14, 2102212464  ;;  %v531_v17 = vsel %vm523_vm15, %v510_v7, %v513_v10 }
  0x7d   :  { %vm1046_vm3 = vcmp.lt.s32.totalorder %v1045_v16, 0  ;;  %v527_v33 = vsel %vm523_vm15, %v507_v45, %v510_v7  ;;  %v532_v30 = vsel %vm526_vm1, %v519_v36, 920167782  ;;  %v597_v4 = vand.u32 2139095040, %v1553_v32 }
  0x7e   :  { %v529_v18 = vsel %vm525_vm0, %v513_v10, %v528_v1  ;;  %v533_v27 = vsel %vm525_vm0, %v516_v14, %v532_v30  ;;  %v535_v34 = vsel %vm523_vm15, %v513_v10, %v516_v14  ;;  %v536_v47 = vsel %vm526_vm1, %v522_v26, 1326507024  ;;  %v1115_v51 = vpop.eup %1114 }
  0x7f   :  { %v168_v43 = vand.u32 3, %v164_v60  ;;  %v265_v63 = vsel %vm180_vm12, %v264_v0, %v1415_v48  ;;  %v443_v46 = vsel %vm441_vm14, %v442_v9, %v1546_v25  ;;  %v534_v54 = vsel %vm524_vm2, %v531_v17, %v533_v27 }
  0x80   :  { %v266_v56 = vsel %vm1570_vm13, %v1284_v20, %v263_v24  ;;  %v537_v40 = vsel %vm525_vm0, %v519_v36, %v536_v47  ;;  %v1610_v38 = vmul.u32.u64.low %v539_v13, %v534_v54  ;;  %v1611_v42 = vmul.u32.u64.high %v539_v13, %v534_v54, %v1610_v38 }
  0x81   :  { %v1117_v60 = vpop.eup %1116  ;;  %v352_v48 = vsel %vm1046_vm3, 0, %v1045_v16  ;;  %v530_v2 = vsel %vm524_vm2, %v527_v33, %v529_v18  ;;  %v538_v0 = vsel %vm524_vm2, %v535_v34, %v537_v40  ;;  %v598_v25 = vshrl.u32 %v597_v4, 23 }
  0x82   :  { %v174_v6 = vxor.u32 2147483648, %v1115_v51  ;;  %v1617_v9 = vadd.s32 %v443_v46, %v439_v22  ;;  %v1619_v7 = vmul.u32.u64.low %v539_v13, %v538_v0  ;;  %v1620_v10 = vmul.u32.u64.high %v539_v13, %v538_v0, %v1619_v7 }
  0x83   :  { %vm169_vm4 = vcmp.lt.s32.totalorder %v168_v43, 2  ;;  %vm170_vm5 = vcmp.eq.s32.totalorder %v168_v43, 0  ;;  %vm173_vm6 = vcmp.eq.s32.totalorder %v168_v43, 2  ;;  %v1055_v24 = vadd.s32 4294967169, %v598_v25 }
  0x84   :  { %v171_v45 = vxor.u32 2147483648, %v1117_v60  ;;  %v357_v39 = vsub.s32 4294967266, %v352_v48  ;;  %v546_v49 = vmul.u32 %v539_v13, %v530_v2  ;;  %v549_v16 = vadd.s32 1, %v1611_v42 }
  0x85   :  { %v267_v62 = vsel %vm1570_vm13, 0, %v265_v63  ;;  %1118 = vcosq.f32 %v266_v56  ;;  %v337_v22 = vadd.s32 %v1454_v12, %v1450_v11  ;;  %v604_v14 = vadd.s32 1, %v1055_v24 }
  0x86   :  { %v175_v15 = vsel %vm173_vm6, %v174_v6, %v1117_v60  ;;  %v353_v23 = vsub.s32 32, %v352_v48  ;;  %v445_v36 = vadd.s32 536870912, %v1617_v9  ;;  %vm548_vm7 = vc.u32 %v1620_v10, %v1610_v38 }
  0x87   :  { %v550_v26 = vsel %vm548_vm7, %v549_v16, %v1611_v42  ;;  %v594_v13 = vand.u32 2147483647, %v1553_v32  ;;  %vm605_vm8 = vcmp.gt.s32.totalorder %v604_v14, 0  ;;  %v700_v52 = vand.u32 2139095040, %v1576_v37 }
  0x88   :  { %v172_v1 = vsel %vm170_vm5, %v1115_v51, %v171_v45  ;;  %v358_v17 = vadd.s32 127, %v357_v39  ;;  %v551_v33 = vadd.s32 %v550_v26, %v546_v49  ;;  %v606_v11 = vsel %vm605_vm8, %v604_v14, 0 }
  0x89   :  { %1120 = vsinq.f32 %v266_v56  ;;  %v1634_v12 = vand.u32 3, %v267_v62  ;;  %v1637_v30 = vadd.f32 0.35, %v1542_v28  ;;  %v608_v4 = vand.u32 31, %v606_v11 }
  0x8a   :  { %v354_v18 = vshll.u32 %v1496_v44, %v352_v48  ;;  %v355_v27 = vshrl.u32 %v337_v22, %v353_v23  ;;  %v1640_v34 = vshrl.u32 %v445_v36, 30  ;;  %v552_v47 = vadd.s32 536870912, %v551_v33 }
  0x8b   :  { %v1643_v63 = vsel %vm169_vm4, %v172_v1, %v175_v15  ;;  %v601_v51 = vand.u32 8388607, %v594_v13  ;;  %v609_v46 = vsub.s32 32, %v608_v4  ;;  %v701_v54 = vshrl.u32 %v700_v52, 23 }
  0x8c   :  { %v359_v56 = vshll.u32 %v358_v17, 23  ;;  %v1647_v40 = vshrl.u32 %v552_v47, 30  ;;  %v611_v28 = vshll.u32 %v1232_v53, %v608_v4  ;;  %v614_v42 = vshll.u32 %v1233_v55, %v608_v4 }
  0x8d   :  { %v612_v44 = vshrl.u32 %v1233_v55, %v609_v46  ;;  %v615_v60 = vshrl.u32 %v1234_v57, %v609_v46  ;;  %v617_v43 = vshll.u32 %v1234_v57, %v608_v4  ;;  %v620_v48 = vshll.u32 %v1235_v59, %v608_v4 }
  0x8e   :  { %v447_v2 = vshll.u32 %v1640_v34, 30  ;;  %v554_v0 = vshll.u32 %v1647_v40, 30  ;;  %v607_v25 = vshrl.u32 %v606_v11, 5  ;;  %v618_v6 = vshrl.u32 %v1235_v59, %v609_v46 }
  0x8f   :  { %v1658_v7 = vor.u32 %v355_v27, %v354_v18  ;;  %v602_v24 = vor.u32 8388608, %v601_v51  ;;  %v621_v45 = vshrl.u32 %v1236_v61, %v609_v46  ;;  %v1059_v39 = vadd.s32 4294967169, %v701_v54 }
  0x90   :  { %v1661_v49 = vsub.s32 %v551_v33, %v554_v0  ;;  %v610_v16 = vshrl.u32 %v1232_v53, %v609_v46  ;;  %v613_v62 = vor.u32 %v612_v44, %v611_v28  ;;  %v616_v22 = vor.u32 %v615_v60, %v614_v42 }
  0x91   :  { %v619_v14 = vor.u32 %v618_v6, %v617_v43  ;;  %v622_v15 = vor.u32 %v621_v45, %v620_v48  ;;  %v623_v23 = vshll.u32 %v1236_v61, %v608_v4  ;;  %v624_v36 = vshrl.u32 %v1237_v8, %v609_v46 }
  0x92   :  { %v1666_v26 = vpop.eup %1118  ;;  %v360_v52 = vor.u32 4788187, %v359_v56  ;;  %v1669_v1 = vsub.s32 %v1617_v9, %v447_v2  ;;  %v557_v17 = vsub.s32 0, %v1661_v49  ;;  %vm626_vm9 = vcmp.lt.s32.totalorder %v607_v25, 1 }
  0x93   :  { %v625_v33 = vor.u32 %v624_v36, %v623_v23  ;;  %vm628_vm10 = vcmp.lt.s32.totalorder %v607_v25, 3  ;;  %vm629_vm11 = vcmp.lt.s32.totalorder %v607_v25, 4  ;;  %v707_v11 = vadd.s32 1, %v1059_v39 }
  0x94   :  { %vm167_vm12 = vweird.f32 %v1281_v19  ;;  %v1052_v18 = vmin.u32 %v557_v17, %v1661_v49  ;;  %vm627_vm13 = vcmp.lt.s32.totalorder %v607_v25, 2  ;;  %v630_v4 = vsel %vm626_vm9, %v610_v16, %v613_v62 }
  0x95   :  { %v642_v27 = vshll.u32 %v602_v24, 8  ;;  %v631_v47 = vsel %vm629_vm11, %v619_v14, 2102212464  ;;  %v634_v51 = vsel %vm626_vm9, %v613_v62, %v616_v22  ;;  %v635_v46 = vsel %vm629_vm11, %v622_v15, 920167782 }
  0x96   :  { %v638_v54 = vsel %vm626_vm9, %v616_v22, %v619_v14  ;;  %v1674_v9 = vpop.eup %1120  ;;  %v559_v56 = vclz %v1052_v18  ;;  %v632_v28 = vsel %vm628_vm10, %v616_v22, %v631_v47  ;;  %v636_v42 = vsel %vm628_vm10, %v619_v14, %v635_v46 }
  0x97   :  { %v639_v44 = vsel %vm629_vm11, %v625_v33, 1326507024  ;;  %v633_v60 = vsel %vm627_vm13, %v630_v4, %v632_v28  ;;  %v637_v43 = vsel %vm627_vm13, %v634_v51, %v636_v42  ;;  %vm708_vm14 = vcmp.gt.s32.totalorder %v707_v11, 0 }
  0x98   :  { %v640_v48 = vsel %vm628_vm10, %v622_v15, %v639_v44  ;;  %v1053_v2 = vadd.s32 4294967294, %v559_v56  ;;  %v1682_v6 = vmul.u32.u64.low %v642_v27, %v637_v43  ;;  %v1683_v24 = vmul.u32.u64.high %v642_v27, %v637_v43, %v1682_v6 }
  0x99   :  { %v641_v0 = vsel %vm627_vm13, %v638_v54, %v640_v48  ;;  %v450_v45 = vsub.s32 0, %v1669_v1  ;;  %v709_v62 = vsel %vm708_vm14, %v707_v11, 0  ;;  %v363_v22 = vcvt.s32.f32 %v1658_v7 }
  0x9a   :  { %v1687_v39 = vmul.u32.u64.low %v642_v27, %v641_v0  ;;  %v1688_v16 = vmul.u32.u64.high %v642_v27, %v641_v0, %v1687_v39  ;;  %v547_v14 = vadd.s32 %v1610_v38, %v1620_v10  ;;  %vm1054_vm15 = vcmp.lt.s32.totalorder %v1053_v2, 0 }
  0x9b   :  { %v711_v15 = vand.u32 31, %v709_v62  ;;  %v361_v23 = vand.u32 2147483647, %v360_v52  ;;  %v562_v25 = vsel %vm1054_vm15, 0, %v1053_v2  ;;  %v649_v36 = vmul.u32 %v642_v27, %v633_v60 }
  0x9c   :  { %v697_v17 = vand.u32 2147483647, %v1576_v37  ;;  %v563_v33 = vsub.s32 32, %v562_v25  ;;  %v564_v18 = vshll.u32 %v1661_v49, %v562_v25  ;;  %v567_v4 = vsub.s32 4294967266, %v562_v25 }
  0x9d   :  { %v652_v47 = vadd.s32 1, %v1683_v24  ;;  %v367_v11 = vsub.s32 4, %v1474_v5  ;;  %v1048_v7 = vmin.u32 %v450_v45, %v1669_v1  ;;  %vm651_vm0 = vc.u32 %v1688_v16, %v1682_v6 }
  0x9e   :  { %v712_v38 = vsub.s32 32, %v711_v15  ;;  %v1702_v10 = vadd.s32 %v1545_v29, %v1551_v31  ;;  %v565_v52 = vshrl.u32 %v547_v14, %v563_v33  ;;  %v568_v27 = vadd.s32 127, %v567_v4 }
  0x9f   :  { %v653_v51 = vsel %vm651_vm0, %v652_v47, %v1683_v24  ;;  %v1708_v49 = vsel %vm167_vm12, nan, %v1643_v63  ;;  %v274_v46 = vxor.u32 2147483648, %v1674_v9  ;;  %v277_v54 = vxor.u32 2147483648, %v1666_v26 }
  0xa0   :  { %vm493_vm1 = vcmp.lt.s32.totalorder %v1472_v3, 0  ;;  %v654_v56 = vadd.s32 %v653_v51, %v649_v36  ;;  %v364_v28 = vmul.f32 %v363_v22, %v361_v23  ;;  %vm1715_vm2 = vcmp.le.f32.partialorder %v491_v50, 0.7853982 }
  0xa1   :  { %v566_v31 = vor.u32 %v565_v52, %v564_v18  ;;  %v569_v42 = vshll.u32 %v568_v27, 23  ;;  %v704_v19 = vand.u32 8388607, %v697_v17  ;;  %v452_v63 = vclz %v1048_v7 }
  0xa2   :  { %v655_v44 = vadd.s32 536870912, %v654_v56  ;;  %v714_v60 = vshll.u32 %v1232_v53, %v711_v15  ;;  %v715_v43 = vshrl.u32 %v1233_v55, %v712_v38  ;;  %v717_v0 = vshll.u32 %v1233_v55, %v711_v15 }
  0xa3   :  { %v570_v48 = vor.u32 4788187, %v569_v42  ;;  %v573_v2 = vcvt.s32.f32 %v566_v31  ;;  %v718_v50 = vshrl.u32 %v1234_v57, %v712_v38  ;;  %vm283_vm3 = vcmp.lt.s32.totalorder %v1287_v21, 0 }
  0xa4   :  { %v1726_v24 = vshrl.u32 %v655_v44, 30  ;;  %v710_v45 = vshrl.u32 %v709_v62, 5  ;;  %v720_v39 = vshll.u32 %v1234_v57, %v711_v15  ;;  %v721_v22 = vshrl.u32 %v1235_v59, %v712_v38 }
  0xa5   :  { %v571_v14 = vand.u32 2147483647, %v570_v48  ;;  %v705_v23 = vor.u32 8388608, %v704_v19  ;;  %v723_v25 = vshll.u32 %v1235_v59, %v711_v15  ;;  %v724_v36 = vshrl.u32 %v1236_v61, %v712_v38 }
  0xa6   :  { %v365_v33 = vxor.u32 2147483648, %v364_v28  ;;  %v657_v18 = vshll.u32 %v1726_v24, 30  ;;  %v726_v4 = vshll.u32 %v1236_v61, %v711_v15  ;;  %v727_v47 = vshrl.u32 %v1237_v8, %v712_v38 }
  0xa7   :  { %v574_v7 = vmul.f32 %v573_v2, %v571_v14  ;;  %v716_v52 = vor.u32 %v715_v43, %v714_v60  ;;  %v719_v62 = vor.u32 %v718_v50, %v717_v0  ;;  %v725_v27 = vor.u32 %v724_v36, %v723_v25 }
  0xa8   :  { %vm1737_vm4 = vcmp.le.f32.partialorder %v281_v41, 0.7853982  ;;  %v1741_v31 = vsub.s32 %v654_v56, %v657_v18  ;;  %v713_v42 = vshrl.u32 %v1232_v53, %v712_v38  ;;  %v722_v19 = vor.u32 %v721_v22, %v720_v39 }
  0xa9   :  { %vm729_vm5 = vcmp.lt.s32.totalorder %v710_v45, 1  ;;  %v1049_v44 = vadd.s32 4294967294, %v452_v63  ;;  %v575_v15 = vxor.u32 2147483648, %v574_v7  ;;  %vm732_vm6 = vcmp.lt.s32.totalorder %v710_v45, 4 }
  0xaa   :  { %v745_v48 = vshll.u32 %v705_v23, 8  ;;  %v660_v60 = vsub.s32 0, %v1741_v31  ;;  %v728_v43 = vor.u32 %v727_v47, %v726_v4  ;;  %vm731_vm7 = vcmp.lt.s32.totalorder %v710_v45, 3 }
  0xab   :  { %v734_v2 = vsel %vm732_vm6, %v722_v19, 2102212464  ;;  %v576_v41 = vsel %vm493_vm1, %v575_v15, %v574_v7  ;;  %vm730_vm8 = vcmp.lt.s32.totalorder %v710_v45, 2  ;;  %v737_v56 = vsel %vm729_vm5, %v716_v52, %v719_v62 }
  0xac   :  { %v738_v38 = vsel %vm732_vm6, %v725_v27, 920167782  ;;  %vm273_vm9 = vcmp.eq.s32.totalorder %v1634_v12, 0  ;;  %vm276_vm10 = vcmp.eq.s32.totalorder %v1634_v12, 2  ;;  %v577_v63 = vsub.s32 4, %v1647_v40 }
  0xad   :  { %v579_v0 = vsel %vm1715_vm2, %v1472_v3, %v576_v41  ;;  %v1056_v50 = vmin.u32 %v660_v60, %v1741_v31  ;;  %v733_v39 = vsel %vm729_vm5, %v713_v42, %v716_v52  ;;  %v735_v22 = vsel %vm731_vm7, %v719_v62, %v734_v2 }
  0xae   :  { %1122 = vcosq.f32 %v579_v0  ;;  %v739_v14 = vsel %vm731_vm7, %v722_v19, %v738_v38  ;;  %v741_v23 = vsel %vm729_vm5, %v719_v62, %v722_v19  ;;  %v742_v18 = vsel %vm732_vm6, %v728_v43, 1326507024 }
  0xaf   :  { %1124 = vsinq.f32 %v579_v0  ;;  %v662_v25 = vclz %v1056_v50  ;;  %v740_v36 = vsel %vm730_vm8, %v737_v56, %v739_v14  ;;  %v366_v4 = vsel %vm283_vm3, %v365_v33, %v364_v28 }
  0xb0   :  { %v743_v47 = vsel %vm731_vm7, %v725_v27, %v742_v18  ;;  %v1766_v7 = vmul.u32.u64.low %v745_v48, %v740_v36  ;;  %v1767_v52 = vmul.u32.u64.high %v745_v48, %v740_v36, %v1766_v7  ;;  %v736_v15 = vsel %vm730_vm8, %v733_v39, %v735_v22 }
  0xb1   :  { %v1057_v42 = vadd.s32 4294967294, %v662_v25  ;;  %v744_v62 = vsel %vm730_vm8, %v741_v23, %v743_v47  ;;  %v803_v19 = vand.u32 2139095040, %v1637_v30  ;;  %vm1050_vm11 = vcmp.lt.s32.totalorder %v1049_v44, 0 }
  0xb2   :  { %v1773_v60 = vmul.u32.u64.low %v745_v48, %v744_v62  ;;  %v1774_v2 = vmul.u32.u64.high %v745_v48, %v744_v62, %v1773_v60  ;;  %v800_v43 = vand.u32 2147483647, %v1637_v30  ;;  %v578_v28 = vsel %vm493_vm1, %v577_v63, %v1647_v40 }
  0xb3   :  { %vm596_vm12 = vcmp.lt.s32.totalorder %v1553_v32, 0  ;;  %v650_v33 = vadd.s32 %v1682_v6, %v1688_v16  ;;  %vm1058_vm13 = vcmp.lt.s32.totalorder %v1057_v42, 0  ;;  %v804_v45 = vshrl.u32 %v803_v19, 23 }
  0xb4   :  { %v1786_v27 = vsel %vm1737_vm4, %v1287_v21, %v366_v4  ;;  %v665_v41 = vsel %vm1058_vm13, 0, %v1057_v42  ;;  %v752_v56 = vmul.u32 %v745_v48, %v736_v15  ;;  %v755_v38 = vadd.s32 1, %v1767_v52 }
  0xb5   :  { %v666_v0 = vsub.s32 32, %v665_v41  ;;  %v667_v50 = vshll.u32 %v1741_v31, %v665_v41  ;;  %v670_v40 = vsub.s32 4294967266, %v665_v41  ;;  %v1063_v63 = vadd.s32 4294967169, %v804_v45 }
  0xb6   :  { %v1791_v39 = vsel %vm1050_vm11, 0, %v1049_v44  ;;  %v580_v6 = vsel %vm1715_vm2, 0, %v578_v28  ;;  %vm1797_vm14 = vcmp.le.f32.partialorder %v594_v13, 0.7853982  ;;  %vm754_vm15 = vc.u32 %v1774_v2, %v1766_v7 }
  0xb7   :  { %v807_v31 = vand.u32 8388607, %v800_v43  ;;  %v668_v48 = vshrl.u32 %v650_v33, %v666_v0  ;;  %v671_v22 = vadd.s32 127, %v670_v40  ;;  %v756_v44 = vsel %vm754_vm15, %v755_v38, %v1767_v52 }
  0xb8   :  { %v810_v14 = vadd.s32 1, %v1063_v63  ;;  %v1811_v13 = vsel %vm273_vm9, %v1666_v26, %v274_v46  ;;  %v1818_v29 = vsel %vm276_vm10, %v277_v54, %v1674_v9  ;;  %v680_v23 = vsub.s32 4, %v1726_v24 }
  0xb9   :  { %v757_v25 = vadd.s32 %v756_v44, %v752_v56  ;;  %v584_v36 = vand.u32 3, %v580_v6  ;;  %v669_v18 = vor.u32 %v668_v48, %v667_v50  ;;  %v672_v4 = vshll.u32 %v671_v22, 23 }
  0xba   :  { %vm811_vm0 = vcmp.gt.s32.totalorder %v810_v14, 0  ;;  %1126 = vcosq.f32 %v1786_v27  ;;  %v460_v47 = vsub.s32 4294967266, %v1791_v39  ;;  %v808_v62 = vor.u32 8388608, %v807_v31 }
  0xbb   :  { %v758_v46 = vadd.s32 536870912, %v757_v25  ;;  %v812_v52 = vsel %vm811_vm0, %v810_v14, 0  ;;  %v1123_v42 = vpop.eup %1122  ;;  %v673_v15 = vor.u32 4788187, %v672_v4  ;;  %v676_v26 = vcvt.s32.f32 %v669_v18 }
  0xbc   :  { %v814_v19 = vand.u32 31, %v812_v52  ;;  %v1125_v9 = vpop.eup %1124  ;;  %v456_v54 = vsub.s32 32, %v1791_v39  ;;  %v590_v60 = vxor.u32 2147483648, %v1123_v42  ;;  %v1827_v28 = vsel %vm596_vm12, %v680_v23, %v1726_v24 }
  0xbd   :  { %v1829_v33 = vshrl.u32 %v758_v46, 30  ;;  %v587_v45 = vxor.u32 2147483648, %v1125_v9  ;;  %vm589_vm1 = vcmp.eq.s32.totalorder %v584_v36, 2  ;;  %v674_v41 = vand.u32 2147483647, %v673_v15 }
  0xbe   :  { %v815_v56 = vsub.s32 32, %v814_v19  ;;  %v1831_v38 = vadd.s32 127, %v460_v47  ;;  %vm585_vm2 = vcmp.lt.s32.totalorder %v584_v36, 2  ;;  %vm586_vm5 = vcmp.eq.s32.totalorder %v584_v36, 0 }
  0xbf   :  { %v760_v0 = vshll.u32 %v1829_v33, 30  ;;  %vm583_vm6 = vweird.f32 %v1472_v3  ;;  %v677_v50 = vmul.f32 %v676_v26, %v674_v41  ;;  %v683_v24 = vsel %vm1797_vm14, 0, %v1827_v28 }
  0xc0   :  { %v753_v40 = vadd.s32 %v1766_v7, %v1774_v2  ;;  %v1840_v63 = vshll.u32 %v808_v62, 8  ;;  %v591_v6 = vsel %vm589_vm1, %v590_v60, %v1125_v9  ;;  %v817_v48 = vshll.u32 %v1232_v53, %v814_v19 }
  0xc1   :  { %v1842_v31 = vsub.s32 %v757_v25, %v760_v0  ;;  %v818_v22 = vshrl.u32 %v1233_v55, %v815_v56  ;;  %v588_v44 = vsel %vm586_vm5, %v1123_v42, %v587_v45  ;;  %v678_v14 = vxor.u32 2147483648, %v677_v50 }
  0xc2   :  { %v820_v23 = vshll.u32 %v1233_v55, %v814_v19  ;;  %v821_v18 = vshrl.u32 %v1234_v57, %v815_v56  ;;  %v813_v47 = vshrl.u32 %v812_v52, 5  ;;  %v816_v7 = vshrl.u32 %v1232_v53, %v815_v56 }
  0xc3   :  { %v763_v4 = vsub.s32 0, %v1842_v31  ;;  %v823_v2 = vshll.u32 %v1234_v57, %v814_v19  ;;  %v679_v25 = vsel %vm596_vm12, %v678_v14, %v677_v50  ;;  %v824_v46 = vshrl.u32 %v1235_v59, %v815_v56 }
  0xc4   :  { %v826_v15 = vshll.u32 %v1235_v59, %v814_v19  ;;  %v827_v42 = vshrl.u32 %v1236_v61, %v815_v56  ;;  %vm272_vm7 = vcmp.lt.s32.totalorder %v1634_v12, 2  ;;  %v592_v55 = vsel %vm585_vm2, %v588_v44, %v591_v6 }
  0xc5   :  { %v682_v52 = vsel %vm1797_vm14, %v1553_v32, %v679_v25  ;;  %v1060_v53 = vmin.u32 %v763_v4, %v1842_v31  ;;  %v819_v57 = vor.u32 %v818_v22, %v817_v48  ;;  %v822_v26 = vor.u32 %v821_v18, %v820_v23 }
  0xc6   :  { %1128 = vcosq.f32 %v682_v52  ;;  %v825_v62 = vor.u32 %v824_v46, %v823_v2  ;;  %v828_v9 = vor.u32 %v827_v42, %v826_v15  ;;  %v829_v59 = vshll.u32 %v1236_v61, %v814_v19 }
  0xc7   :  { %1130 = vsinq.f32 %v682_v52  ;;  %v765_v60 = vclz %v1060_v53  ;;  %v830_v28 = vshrl.u32 %v1237_v8, %v815_v56  ;;  %v1864_v45 = vpop.eup %1126  ;;  %vm832_vm8 = vcmp.lt.s32.totalorder %v813_v47, 1 }
  0xc8   :  { %vm833_vm9 = vcmp.lt.s32.totalorder %v813_v47, 2  ;;  %vm834_vm10 = vcmp.lt.s32.totalorder %v813_v47, 3  ;;  %vm835_vm11 = vcmp.lt.s32.totalorder %v813_v47, 4  ;;  %v836_v41 = vsel %vm832_vm8, %v816_v7, %v819_v57 }
  0xc9   :  { %v1061_v16 = vadd.s32 4294967294, %v765_v60  ;;  %v831_v36 = vor.u32 %v830_v28, %v829_v59  ;;  %v837_v0 = vsel %vm835_vm11, %v825_v62, 2102212464  ;;  %v840_v6 = vsel %vm832_vm8, %v819_v57, %v822_v26 }
  0xca   :  { %v838_v50 = vsel %vm834_vm10, %v822_v26, %v837_v0  ;;  %v841_v48 = vsel %vm835_vm11, %v828_v9, 920167782  ;;  %v844_v22 = vsel %vm832_vm8, %v822_v26, %v825_v62  ;;  %vm270_vm12 = vweird.f32 %v1284_v20 }
  0xcb   :  { %v593_v61 = vsel %vm583_vm6, nan, %v592_v55  ;;  %vm1062_vm13 = vcmp.lt.s32.totalorder %v1061_v16, 0  ;;  %v842_v8 = vsel %vm834_vm10, %v825_v62, %v841_v48  ;;  %v845_v19 = vsel %vm835_vm11, %v831_v36, 1326507024 }
  0xcc   :  { %v768_v56 = vsel %vm1062_vm13, 0, %v1061_v16  ;;  %v839_v44 = vsel %vm833_vm9, %v836_v41, %v838_v50  ;;  %v843_v14 = vsel %vm833_vm9, %v840_v6, %v842_v8  ;;  %v846_v23 = vsel %vm834_vm10, %v828_v9, %v845_v19 }
  0xcd   :  { %v769_v18 = vsub.s32 32, %v768_v56  ;;  %v770_v4 = vshll.u32 %v1842_v31, %v768_v56  ;;  %v773_v7 = vsub.s32 4294967266, %v768_v56  ;;  %v847_v2 = vsel %vm833_vm9, %v844_v22, %v846_v23 }
  0xce   :  { %v1877_v3 = vmul.u32.u64.low %v1840_v63, %v847_v2  ;;  %v1878_v25 = vmul.u32.u64.high %v1840_v63, %v847_v2, %v1877_v3  ;;  %v1881_v46 = vmul.u32.u64.low %v1840_v63, %v843_v14  ;;  %v1882_v15 = vmul.u32.u64.high %v1840_v63, %v843_v14, %v1881_v46 }
  0xcf   :  { %v687_v42 = vand.u32 3, %v683_v24  ;;  %v771_v55 = vshrl.u32 %v753_v40, %v769_v18  ;;  %v774_v52 = vadd.s32 127, %v773_v7  ;;  %v903_v53 = vsub.f32 %v1708_v49, %v593_v61 }
  0xd0   :  { %v279_v31 = vsel %vm272_vm7, %v1811_v13, %v1818_v29  ;;  %v368_v47 = vsel %vm283_vm3, %v367_v11, %v1474_v5  ;;  %1132 = vsinq.f32 %v1786_v27  ;;  %v457_v24 = vshll.u32 %v1669_v1, %v1791_v39 }
  0xd1   :  { %v772_v40 = vor.u32 %v771_v55, %v770_v4  ;;  %v775_v57 = vshll.u32 %v774_v52, 23  ;;  %v855_v49 = vmul.u32 %v1840_v63, %v839_v44  ;;  %v1899_v26 = vmul.f32 4.0, %v903_v53 }
  0xd2   :  { %v458_v12 = vshrl.u32 %v1702_v10, %v456_v54  ;;  %v462_v13 = vshll.u32 %v1831_v38, 23  ;;  %vm857_vm3 = vc.u32 %v1878_v25, %v1881_v46  ;;  %v858_v5 = vadd.s32 1, %v1882_v15 }
  0xd3   :  { %v1129_v11 = vpop.eup %1128  ;;  %vm692_vm14 = vcmp.eq.s32.totalorder %v687_v42, 2  ;;  %v776_v1 = vor.u32 4788187, %v775_v57  ;;  %v779_v27 = vcvt.s32.f32 %v772_v40  ;;  %v915_v29 = vand.u32 2147483647, %v1899_v26 }
  0xd4   :  { %v1131_v63 = vpop.eup %1130  ;;  %vm688_vm15 = vcmp.lt.s32.totalorder %v687_v42, 2  ;;  %vm689_vm0 = vcmp.eq.s32.totalorder %v687_v42, 0  ;;  %v693_v62 = vxor.u32 2147483648, %v1129_v11  ;;  %v859_v39 = vsel %vm857_vm3, %v858_v5, %v1882_v15 }
  0xd5   :  { %v690_v10 = vxor.u32 2147483648, %v1131_v63  ;;  %v777_v54 = vand.u32 2147483647, %v776_v1  ;;  %v860_v38 = vadd.s32 %v859_v39, %v855_v49  ;;  %v919_v9 = vsub.f32 0.0, %v915_v29 }
  0xd6   :  { %v280_v60 = vsel %vm270_vm12, nan, %v279_v31  ;;  %v459_v59 = vor.u32 %v458_v12, %v457_v24  ;;  %vm686_vm1 = vweird.f32 %v1553_v32  ;;  %v694_v28 = vsel %vm692_vm14, %v693_v62, %v1131_v63 }
  0xd7   :  { %v691_v16 = vsel %vm689_vm0, %v1129_v11, %v690_v10  ;;  %v780_v36 = vmul.f32 %v779_v27, %v777_v54  ;;  %v861_v41 = vadd.s32 536870912, %v860_v38  ;;  %v923_v0 = vmul.f32 1.442695, %v919_v9 }
  0xd8   :  { %v463_v50 = vor.u32 4788187, %v462_v13  ;;  %v695_v6 = vsel %vm688_vm15, %v691_v16, %v694_v28  ;;  %vm1917_vm2 = vcmp.le.f32.partialorder %v697_v17, 0.7853982  ;;  %vm699_vm5 = vcmp.lt.s32.totalorder %v1576_v37, 0 }
  0xd9   :  { %v696_v20 = vsel %vm686_vm1, nan, %v695_v6  ;;  %v781_v22 = vxor.u32 2147483648, %v780_v36  ;;  %v1922_v32 = vshrl.u32 %v861_v41, 30  ;;  %1134 = vpow2.f32 %v923_v0 }
  0xda   :  { %v904_v61 = vsub.f32 %v280_v60, %v696_v20  ;;  %v370_v8 = vsel %vm1737_vm4, 0, %v368_v47  ;;  %v466_v19 = vcvt.s32.f32 %v459_v59  ;;  %v464_v44 = vand.u32 2147483647, %v463_v50 }
  0xdb   :  { %v782_v56 = vsel %vm699_vm5, %v781_v22, %v780_v36  ;;  %v863_v17 = vshll.u32 %v1922_v32, 30  ;;  %v783_v14 = vsub.s32 4, %v1829_v33  ;;  %v374_v2 = vand.u32 3, %v370_v8 }
  0xdc   :  { %v785_v23 = vsel %vm1917_vm2, %v1576_v37, %v782_v56  ;;  %v1933_v18 = vmul.f32 4.0, %v904_v61  ;;  %v467_v15 = vmul.f32 %v466_v19, %v464_v44  ;;  %v380_v53 = vxor.u32 2147483648, %v1864_v45 }
  0xdd   :  { %v1133_v4 = vpop.eup %1132  ;;  %1136 = vcosq.f32 %v785_v23  ;;  %v864_v7 = vsub.s32 %v860_v38, %v863_v17  ;;  %v784_v42 = vsel %vm699_vm5, %v783_v14, %v1829_v33  ;;  %vm379_vm4 = vcmp.eq.s32.totalorder %v374_v2, 2 }
  0xde   :  { %1138 = vsinq.f32 %v785_v23  ;;  %v916_v51 = vand.u32 2147483647, %v1933_v18  ;;  %v377_v47 = vxor.u32 2147483648, %v1133_v4  ;;  %v786_v24 = vsel %vm1917_vm2, 0, %v784_v42 }
  0xdf   :  { %v866_v3 = vsub.s32 0, %v864_v7  ;;  %vm376_vm6 = vcmp.eq.s32.totalorder %v374_v2, 0  ;;  %v468_v57 = vxor.u32 2147483648, %v467_v15  ;;  %vm386_vm7 = vcmp.lt.s32.totalorder %v1393_v58, 0 }
  0xe0   :  { %v920_v55 = vsub.f32 0.0, %v916_v51  ;;  %vm375_vm8 = vcmp.lt.s32.totalorder %v374_v2, 2  ;;  %v381_v33 = vsel %vm379_vm4, %v380_v53, %v1133_v4  ;;  %v790_v13 = vand.u32 3, %v786_v24 }
  0xe1   :  { %v1064_v52 = vmin.u32 %v866_v3, %v864_v7  ;;  %v378_v5 = vsel %vm376_vm6, %v1864_v45, %v377_v47  ;;  %v856_v11 = vadd.s32 %v1881_v46, %v1878_v25  ;;  %vm1948_vm10 = vcmp.le.f32.partialorder %v384_v35, 0.7853982 }
  0xe2   :  { %v925_v31 = vmul.f32 1.442695, %v920_v55  ;;  %v469_v29 = vsel %vm386_vm7, %v468_v57, %v467_v15  ;;  %vm373_vm11 = vweird.f32 %v1287_v21  ;;  %v382_v25 = vsel %vm375_vm8, %v378_v5, %v381_v33 }
  0xe3   :  { %v868_v40 = vclz %v1064_v52  ;;  %vm795_vm12 = vcmp.eq.s32.totalorder %v790_v13, 2  ;;  %vm792_vm13 = vcmp.eq.s32.totalorder %v790_v13, 0  ;;  %v472_v9 = vsel %vm1948_vm10, %v1393_v58, %v469_v29 }
  0xe4   :  { %1140 = vpow2.f32 %v925_v31  ;;  %vm789_vm3 = vweird.f32 %v1576_v37  ;;  %vm791_vm14 = vcmp.lt.s32.totalorder %v790_v13, 2  ;;  %v383_v41 = vsel %vm373_vm11, nan, %v382_v25 }
  0xe5   :  { %v1065_v49 = vadd.s32 4294967294, %v868_v40  ;;  %v470_v17 = vsub.s32 4, %v1640_v34  ;;  %vm802_vm15 = vcmp.lt.s32.totalorder %v1637_v30, 0  ;;  %vm1968_vm0 = vcmp.le.f32.partialorder %v800_v43, 0.7853982 }
  0xe6   :  { %v1135_v12 = vpop.eup %1134  ;;  %v911_v2 = vmax.f32 %v1899_v26, 0.0  ;;  %v886_v55 = vsub.s32 4, %v1922_v32  ;;  %v912_v29 = vmax.f32 %v1933_v18, 0.0  ;;  %vm476_vm8 = vweird.f32 %v1393_v58 }
  0xe7   :  { %vm1066_vm9 = vcmp.lt.s32.totalorder %v1065_v49, 0  ;;  %v931_v1 = vadd.f32 1.0, %v1135_v12  ;;  %v934_v36 = vmul.f32 -0.5, %v1135_v12  ;;  %v937_v19 = vand.u32 2147483647, %v1135_v12 }
  0xe8   :  { %v871_v63 = vsel %vm1066_vm9, 0, %v1065_v49  ;;  %v471_v3 = vsel %vm386_vm7, %v470_v17, %v1640_v34  ;;  %v887_v40 = vsel %vm802_vm15, %v886_v55, %v1922_v32  ;;  %vm892_vm11 = vweird.f32 %v1637_v30 }
  0xe9   :  { %v872_v62 = vsub.s32 32, %v871_v63  ;;  %v873_v39 = vshll.u32 %v864_v7, %v871_v63  ;;  %v876_v10 = vsub.s32 4294967266, %v871_v63  ;;  %1142 = vlog2.f32 %v931_v1 }
  0xea   :  { %v1137_v45 = vpop.eup %1136  ;;  %1144 = vcosq.f32 %v472_v9  ;;  %v935_v37 = vadd.f32 1.0, %v934_v36  ;;  %vm938_vm1 = vcmp.lt.f32.partialorder %v937_v19, 0.0004427343  ;;  %v473_v47 = vsel %vm1948_vm10, 0, %v471_v3 }
  0xeb   :  { %v1139_v46 = vpop.eup %1138  ;;  %v796_v35 = vxor.u32 2147483648, %v1137_v45  ;;  %v874_v54 = vshrl.u32 %v856_v11, %v872_v62  ;;  %v877_v38 = vadd.s32 127, %v876_v10  ;;  %1146 = vsinq.f32 %v472_v9 }
  0xec   :  { %v793_v60 = vxor.u32 2147483648, %v1139_v46  ;;  %v936_v7 = vmul.f32 %v1135_v12, %v935_v37  ;;  %v477_v12 = vand.u32 3, %v473_v47  ;;  %v889_v13 = vsel %vm1968_vm0, 0, %v887_v40 }
  0xed   :  { %v797_v59 = vsel %vm795_vm12, %v796_v35, %v1139_v46  ;;  %v875_v28 = vor.u32 %v874_v54, %v873_v39  ;;  %v878_v16 = vshll.u32 %v877_v38, 23  ;;  %v893_v63 = vand.u32 3, %v889_v13 }
  0xee   :  { %v794_v0 = vsel %vm792_vm13, %v1137_v45, %v793_v60  ;;  %vm479_vm2 = vcmp.eq.s32.totalorder %v477_v12, 0  ;;  %vm482_vm5 = vcmp.eq.s32.totalorder %v477_v12, 2  ;;  %vm478_vm6 = vcmp.lt.s32.totalorder %v477_v12, 2 }
  0xef   :  { %v798_v50 = vsel %vm791_vm14, %v794_v0, %v797_v59  ;;  %v879_v6 = vor.u32 4788187, %v878_v16  ;;  %v882_v48 = vcvt.s32.f32 %v875_v28  ;;  %vm898_vm7 = vcmp.eq.s32.totalorder %v893_v63, 2 }
  0xf0   :  { %v799_v20 = vsel %vm789_vm3, nan, %v798_v50  ;;  %vm895_vm9 = vcmp.eq.s32.totalorder %v893_v63, 0  ;;  %vm894_vm10 = vcmp.lt.s32.totalorder %v893_v63, 2 }
  0xf1   :  { %v1141_v22 = vpop.eup %1140  ;;  %v880_v61 = vand.u32 2147483647, %v879_v6  ;;  %v905_v8 = vsub.f32 %v383_v41, %v799_v20 }
  0xf2   :  { %v940_v56 = vadd.f32 1.0, %v1141_v22  ;;  %v943_v53 = vmul.f32 -0.5, %v1141_v22  ;;  %v946_v33 = vand.u32 2147483647, %v1141_v22 }
  0xf3   :  { %v883_v44 = vmul.f32 %v882_v48, %v880_v61  ;;  %v1963_v14 = vmul.f32 4.0, %v905_v8 }
  0xf4   :  { %1148 = vlog2.f32 %v940_v56  ;;  %v944_v57 = vadd.f32 1.0, %v943_v53  ;;  %vm947_vm4 = vcmp.lt.f32.partialorder %v946_v33, 0.0004427343 }
  0xf5   :  { %v884_v23 = vxor.u32 2147483648, %v883_v44  ;;  %v917_v4 = vand.u32 2147483647, %v1963_v14 }
  0xf6   :  { %v1143_v51 = vpop.eup %1142  ;;  %v945_v1 = vmul.f32 %v1141_v22, %v944_v57 }
  0xf7   :  { %v885_v15 = vsel %vm802_vm15, %v884_v23, %v883_v44  ;;  %v921_v42 = vsub.f32 0.0, %v917_v4  ;;  %v933_v43 = vmul.f32 0.6931472, %v1143_v51  ;;  %v1145_v24 = vpop.eup %1144 }
  0xf8   :  { %v888_v52 = vsel %vm1968_vm0, %v1637_v30, %v885_v15  ;;  %v1147_v49 = vpop.eup %1146  ;;  %v483_v11 = vxor.u32 2147483648, %v1145_v24  ;;  %v913_v30 = vmax.f32 %v1963_v14, 0.0 }
  0xf9   :  { %1150 = vcosq.f32 %v888_v52  ;;  %v927_v31 = vmul.f32 1.442695, %v921_v42  ;;  %v939_v26 = vsel %vm938_vm1, %v936_v7, %v933_v43  ;;  %v480_v5 = vxor.u32 2147483648, %v1147_v49 }
  0xfa   :  { %1152 = vsinq.f32 %v888_v52  ;;  %v1985_v34 = vadd.f32 %v939_v26, %v911_v2  ;;  %v484_v39 = vsel %vm482_vm5, %v483_v11, %v1147_v49 }
  0xfb   :  { %1154 = vpow2.f32 %v927_v31  ;;  %v481_v32 = vsel %vm479_vm2, %v1145_v24, %v480_v5 }
  0xfc   :  { %v485_v35 = vsel %vm478_vm6, %v481_v32, %v484_v39 }
  0xfd   :  { %v486_v59 = vsel %vm476_vm8, nan, %v485_v35 }
 0x101   :  { %v1149_v27 = vpop.eup %1148 }
 0x102   :  { %v942_v62 = vmul.f32 0.6931472, %v1149_v27 }
 0x104   :  { %v948_v10 = vsel %vm947_vm4, %v945_v1, %v942_v62 }
 0x105   :  { %v1993_v45 = vadd.f32 %v948_v10, %v912_v29 }
 0x106   :  { %v1151_v25 = vpop.eup %1150 }
 0x107   :  { %v1153_v46 = vpop.eup %1152  ;;  %v899_v54 = vxor.u32 2147483648, %v1151_v25 }
 0x108   :  { %v1155_v38 = vpop.eup %1154  ;;  %v896_v18 = vxor.u32 2147483648, %v1153_v46 }
 0x109   :  { %v900_v9 = vsel %vm898_vm7, %v899_v54, %v1153_v46  ;;  %v949_v60 = vadd.f32 1.0, %v1155_v38  ;;  %v952_v50 = vmul.f32 -0.5, %v1155_v38  ;;  %v955_v20 = vand.u32 2147483647, %v1155_v38 }
 0x10a   :  { %v897_v28 = vsel %vm895_vm9, %v1151_v25, %v896_v18 }
 0x10b   :  { %v901_v16 = vsel %vm894_vm10, %v897_v28, %v900_v9  ;;  %1156 = vlog2.f32 %v949_v60  ;;  %v953_v48 = vadd.f32 1.0, %v952_v50  ;;  %vm956_vm12 = vcmp.lt.f32.partialorder %v955_v20, 0.0004427343 }
 0x10c   :  { %v902_v36 = vsel %vm892_vm11, nan, %v901_v16 }
 0x10d   :  { %v906_v41 = vsub.f32 %v486_v59, %v902_v36  ;;  %v954_v61 = vmul.f32 %v1155_v38, %v953_v48 }
 0x10f   :  { %v910_v0 = vmul.f32 4.0, %v906_v41 }
 0x111   :  { %v918_v6 = vand.u32 2147483647, %v910_v0  ;;  %v914_v2 = vmax.f32 %v910_v0, 0.0 }
 0x113   :  { %v922_v58 = vsub.f32 0.0, %v918_v6 }
 0x115   :  { %v929_v22 = vmul.f32 1.442695, %v922_v58 }
 0x117   :  { %1158 = vpow2.f32 %v929_v22 }
 0x118   :  { %v1157_v8 = vpop.eup %1156 }
 0x119   :  { %v951_v37 = vmul.f32 0.6931472, %v1157_v8 }
 0x11b   :  { %v957_v19 = vsel %vm956_vm12, %v954_v61, %v951_v37 }
 0x11c   :  { %v969_v56 = vadd.f32 %v957_v19, %v913_v30 }
 0x124   :  { %v1159_v17 = vpop.eup %1158 }
 0x125   :  { %v958_v44 = vadd.f32 1.0, %v1159_v17  ;;  %v961_v21 = vmul.f32 -0.5, %v1159_v17  ;;  %v964_v4 = vand.u32 2147483647, %v1159_v17 }
 0x127   :  { %1160 = vlog2.f32 %v958_v44  ;;  %v962_v23 = vadd.f32 1.0, %v961_v21  ;;  %vm965_vm13 = vcmp.lt.f32.partialorder %v964_v4, 0.0004427343 }
 0x129   :  { %v963_v7 = vmul.f32 %v1159_v17, %v962_v23 }
 0x134   :  { %v1161_v51 = vpop.eup %1160  ;;  %976 = sbr.rel (%p1068_p10) target bundleno = 332 (0x14c), region = 21 }
 0x135   :  { %v960_v3 = vmul.f32 0.6931472, %v1161_v51 }
 0x137   :  { %v966_v15 = vsel %vm965_vm13, %v963_v7, %v960_v3 }
 0x138   :  { %v970_v42 = vadd.f32 %v966_v15, %v914_v2 }
 0x139   :  { %v978_v14 = vlaneseq  ;;  %v998_v47 = vstv %s2014_s0 }
 0x13b   :  { %v979_v43 = vshrl.u32 %v978_v14, 7  ;;  %v984_v55 = vand.u32 127, %v978_v14 }
 0x13d   :  { %v980_v52 = vadd.s32 8, %v979_v43  ;;  %v981_v53 = vadd.s32 16, %v979_v43  ;;  %v982_v31 = vadd.s32 24, %v979_v43  ;;  %v985_v26 = vmul.u32 128, %v979_v43 }
 0x13f   :  { %v986_v24 = vmul.u32 128, %v980_v52  ;;  %v987_v40 = vmul.u32 128, %v981_v53  ;;  %v994_v57 = vadd.s32 %v985_v26, %v984_v55 }
 0x140   :  { %v988_v49 = vmul.u32 128, %v982_v31 }
 0x141   :  { %v995_v12 = vadd.s32 %v986_v24, %v984_v55  ;;  %v996_v33 = vadd.s32 %v987_v40, %v984_v55  ;;  %vm999_vm3 = vcmp.lt.s32.totalorder %v994_v57, %v998_v47 }
 0x142   :  { %v997_v13 = vadd.s32 %v988_v49, %v984_v55  ;;  %v1003_v5 = vsel %vm999_vm3, %v1985_v34, 0.0 }
 0x143   :  { %vm1000_vm14 = vcmp.lt.s32.totalorder %v995_v12, %v998_v47  ;;  %vm1001_vm15 = vcmp.lt.s32.totalorder %v996_v33, %v998_v47 }
 0x144   :  { %vm1002_vm0 = vcmp.lt.s32.totalorder %v997_v13, %v998_v47  ;;  %v1004_v11 = vsel %vm1000_vm14, %v1993_v45, 0.0  ;;  %v1005_v1 = vsel %vm1001_vm15, %v969_v56, 0.0 }
 0x145   :  { %v1007_v27 = vadd.f32 %v1004_v11, %v1003_v5  ;;  %v1006_v29 = vsel %vm1002_vm0, %v970_v42, 0.0 }
 0x147   :  { %v1008_v63 = vadd.f32 %v1007_v27, %v1005_v1 }
 0x149   :  { %v1009_v62 = vadd.f32 %v1008_v63, %v1006_v29 }
 0x14b   :  { %1010 = vst [vmem:[#allocation9] sm:$0xff] %v1009_v62 }
 0x14c PF:  { %p1070_p11 = scmp.lt.s32.totalorder %s2014_s0, 4096 }
 0x14e   :  { %1014 = sbr.rel (%p1070_p11) target bundleno = 346 (0x15a), region = 25 }
 0x153   :  { %v1015_v32 = vadd.f32 %v1993_v45, %v1985_v34 }
 0x155   :  { %v1016_v39 = vadd.f32 %v1015_v32, %v969_v56 }
 0x157   :  { %v1017_v10 = vadd.f32 %v1016_v39, %v970_v42 }
 0x159   :  { %1018 = vst [vmem:[#allocation9] sm:$0xff] %v1017_v10 }
 0x15a PF:  { %s1238_s28 = smov [#allocation9]  }
 0x15b   :  { %s1025_s29 = sshll.u32 %s1238_s28, 4  ;;  %s1026_s29 = int_to_ptr.vmem [resolvable:$true] %s1025_s29 }
 0x15c   :  { %s1202_s30 = scalar_lea.vmem %s1026_s29, 128  ;;  %p1207_p13 = scmp.lt.s32.totalorder %s1026_s29, %s1026_s29 }
 0x15d   :  { %p1203_p12 = scmp.ne.s32.totalorder %s1026_s29, %s1202_s30  ;;  %p1208_p0 = scmp.lt.s32.totalorder %s1202_s30, %s1202_s30 }
 0x15f   :  { %p1209_p1 = por %p1208_p0, %p1207_p13 }
 0x161   :  { %p1210_p2 = pnand %p1209_p1, %p1203_p12 }
 0x163   :  { %1213 = shalt.err (!%p1210_p2)
}
 0x164   :  { %1028 = dma.vmem_to_hbm [thread:$0]  %s1026_s29, 128, %s2017_s3, [#allocation6]  }
 0x165   :  { %1226 = dma.done.wait [#allocation6], 128  }
 0x166   :  { %1227 = vsyncadd [#allocation6], 4294967168 }
 0x167   :  { %1032 = vsyncpa [#allocation5], 1 }
 0x168   :  { %1033 = vsyncpa [#allocation8], 1 }
 0x169   :  { %1034 = vsyncpa [#allocation6], 1 }

</bundles_post_ra>
